<compile_context>
chip_gen: v7x
topology: tpu7x:2x2x1
jax: 0.10.0
libtpu: 0.0.40
codegen_flags: <defaults>
</compile_context>

<pallas_src>
import functools

import numpy as np

import jax
import jax.numpy as jnp
from jax.experimental import pallas as pl
from jax.experimental.pallas import tpu as pltpu


# ----------------------------------------------------------------------------
# Pallas kernels
# ----------------------------------------------------------------------------
def _bilinear_up_kernel(x_ref, mwt_ref, mh_ref, o_ref, *, row_off, col_off):
    """Fused separable 2x bilinear upsample of one (batch, channel) plane.

    x_ref:   (1, 1, h, w)     input plane (f32, cast to bf16 in-kernel)
    mwt_ref: (w, Wo)          bf16 width interpolation matrix (transposed)
    mh_ref:  (Ho, h)          bf16 height interpolation matrix
    o_ref:   (1, 1, Hp, Wp)   zero-padded conv-input layout; the (Ho, Wo)
                              result lands at [row_off:, col_off:], zeros
                              elsewhere (conv halo + UNet diff-padding).
    """
    xb = x_ref[0, 0].astype(jnp.bfloat16)
    z = jnp.dot(xb, mwt_ref[...], preferred_element_type=jnp.float32)   # (h, Wo)
    t = jnp.dot(mh_ref[...], z.astype(jnp.bfloat16),
                preferred_element_type=jnp.float32)                      # (Ho, Wo)
    o_ref[0, 0] = jnp.zeros(o_ref.shape[2:], o_ref.dtype)
    ho, wo = t.shape
    o_ref[0, 0, pl.ds(row_off, ho), pl.ds(col_off, wo)] = t.astype(o_ref.dtype)


def _conv3x3_bn_relu_kernel(*refs, cins, hh, wp):
    """3x3 conv (pad=1) + folded-BN bias + ReLU for one (stream, batch).

    refs = (x_group refs..., w_ref, b_ref, mask_ref, o_ref, stage_ref)
      x_g:   (1, 1, Cg, Fp)    bf16 zero-padded input, Fp = (hh + 3) * wp
      w_ref: (1, Cout, K)      bf16 folded weights, K = 9 * sum(cins)
      b_ref: (1, Cout, 1)      f32 folded bias
      mask:  (1, P)            f32 0/1, zero on the 2 junk columns per row
      o_ref: (1, 1, Cout, Fp)  output, SAME zero-padded layout as the input
      stage: (K, P)            bf16 VMEM scratch, P = hh * wp
    """
    ng = len(cins)
    x_refs = refs[:ng]
    w_ref, b_ref, mask_ref, o_ref, stage_ref = refs[ng:]
    p = hh * wp

    # Stage the 9 shifted tap views of every input group -> (K, P).
    row = 0
    for g in range(ng):
        cg = cins[g]
        for k in range(9):
            off = (k // 3) * wp + (k % 3)                 # static flat offset
            stage_ref[pl.ds(row, cg), :] = x_refs[g][0, 0, :, pl.ds(off, p)]
            row += cg

    # One MXU push with contraction K = 9 * sum(Cin), f32 accumulation.
    y = jnp.dot(w_ref[0], stage_ref[...], preferred_element_type=jnp.float32)
    y = jnp.maximum(y + b_ref[0], 0.0) * mask_ref[...]    # bias, ReLU, zero junk

    # Store in the zero-padded layout: valid pixel (y, x) -> (y+1)*wp + (x+1);
    # the zeroed junk columns land exactly on the left/right pad columns.
    cout = o_ref.shape[2]
    o_ref[0, 0, :, pl.ds(0, wp + 1)] = jnp.zeros((cout, wp + 1), o_ref.dtype)
    o_ref[0, 0, :, pl.ds(wp + 1, p)] = y.astype(o_ref.dtype)
    o_ref[0, 0, :, pl.ds((hh + 1) * wp + 1, 2 * wp - 1)] = jnp.zeros(
        (cout, 2 * wp - 1), o_ref.dtype)


# ----------------------------------------------------------------------------
# Wrappers
# ----------------------------------------------------------------------------
def _interp_matrix(in_size, out_size):
    """PyTorch bilinear align_corners=True interpolation matrix (out, in)."""
    if in_size == 1:
        return np.ones((out_size, 1), np.float32)
    src = np.arange(out_size, dtype=np.float64) * (in_size - 1) / (out_size - 1)
    lo = np.clip(np.floor(src).astype(np.int64), 0, in_size - 2)
    frac = (src - lo).astype(np.float32)
    m = np.zeros((out_size, in_size), np.float32)
    m[np.arange(out_size), lo] += 1.0 - frac
    m[np.arange(out_size), lo + 1] += frac
    return m


def bilinear_up2x_to_padded(x, hs, ws, out_dtype=jnp.bfloat16):
    """nn.Upsample(scale_factor=2, bilinear, align_corners=True) of every
    (b, c) plane of x, emitted directly in the zero-padded conv-input layout
    of spatial size (hs, ws): output (B, C, hs + 3, ws + 2)."""
    b, c, h, w = x.shape
    ho, wo = 2 * h, 2 * w
    dy, dx = hs - ho, ws - wo
    assert dy >= 0 and dx >= 0, "skip feature must be at least as large"
    hp, wpad = hs + 3, ws + 2
    mwt = jnp.asarray(_interp_matrix(w, wo).T, dtype=jnp.bfloat16)   # (w, Wo)
    mh = jnp.asarray(_interp_matrix(h, ho), dtype=jnp.bfloat16)      # (Ho, h)
    return pl.pallas_call(
        functools.partial(_bilinear_up_kernel,
                          row_off=1 + dy // 2, col_off=1 + dx // 2),
        out_shape=jax.ShapeDtypeStruct((b, c, hp, wpad), out_dtype),
        grid=(b, c),
        in_specs=[
            pl.BlockSpec((1, 1, h, w), lambda i, j: (i, j, 0, 0)),
            pl.BlockSpec((w, wo), lambda i, j: (0, 0)),
            pl.BlockSpec((ho, h), lambda i, j: (0, 0)),
        ],
        out_specs=pl.BlockSpec((1, 1, hp, wpad), lambda i, j: (i, j, 0, 0)),
        compiler_params=pltpu.CompilerParams(
            dimension_semantics=("parallel", "parallel")),
    )(x, mwt, mh)


def conv3x3_bn_relu(inputs, cins, wk, bk, hh, ww, out_dtype):
    """Conv2d(k=3, pad=1) -> folded BN (inference) -> ReLU, both streams.

    inputs: list of (2, N, Cg, Fp) bf16 arrays in the zero-padded layout
    wk:     (2, Cout, 9*sum(cins)) bf16 folded weights
    bk:     (2, Cout, 1)           f32 folded bias
    returns (2, N, Cout, Fp) in `out_dtype`, same zero-padded layout.
    """
    s2, n = inputs[0].shape[:2]
    wp = ww + 2
    p = hh * wp
    fp = (hh + 3) * wp
    cout, ktot = wk.shape[1], wk.shape[2]

    # 0/1 mask zeroing the two junk columns of each spatial row.
    mask = jnp.asarray(
        np.tile(np.concatenate([np.ones(ww, np.float32),
                                np.zeros(2, np.float32)]), hh).reshape(1, p))

    in_specs = [pl.BlockSpec((1, 1, int(cg), fp), lambda s, i: (s, i, 0, 0))
                for cg in cins]
    in_specs += [
        pl.BlockSpec((1, cout, ktot), lambda s, i: (s, 0, 0)),
        pl.BlockSpec((1, cout, 1), lambda s, i: (s, 0, 0)),
        pl.BlockSpec((1, p), lambda s, i: (0, 0)),
    ]
    return pl.pallas_call(
        functools.partial(_conv3x3_bn_relu_kernel,
                          cins=tuple(int(c) for c in cins), hh=hh, wp=wp),
        out_shape=jax.ShapeDtypeStruct((s2, n, cout, fp), out_dtype),
        grid=(s2, n),
        in_specs=in_specs,
        out_specs=pl.BlockSpec((1, 1, cout, fp), lambda s, i: (s, i, 0, 0)),
        scratch_shapes=[pltpu.VMEM((ktot, p), jnp.bfloat16)],
        compiler_params=pltpu.CompilerParams(
            dimension_semantics=("parallel", "parallel")),
    )(*inputs, wk, bk, mask)


# ----------------------------------------------------------------------------
# BN folding (done once, OUTSIDE the jitted forward)
# ----------------------------------------------------------------------------
def _fold_conv_bn(pg, groups_split=None, eps=1e-5):
    """Fold inference BN into conv weights/bias.

    Returns wk (Cout, 9*Cin) bf16 with columns ordered
    [group0: tap0..8 x channels, group1: ...] and bias (Cout, 1) f32."""
    w, b, gamma, beta, mean, var = pg
    cout = w.shape[0]
    scale = gamma / jnp.sqrt(var + eps)
    groups = [w] if groups_split is None else [w[:, :groups_split], w[:, groups_split:]]
    wk = jnp.concatenate(
        [jnp.transpose(g, (0, 2, 3, 1)).reshape(cout, -1) for g in groups], axis=1)
    wk = (wk * scale[:, None]).astype(jnp.bfloat16)
    bias = ((b - mean) * scale + beta).reshape(cout, 1).astype(jnp.float32)
    return wk, bias


def prepare_folded_params(params, in_channels):
    cup = in_channels // 2
    w1a, b1a = _fold_conv_bn(params["dc1"]["conv1"], groups_split=cup)
    w1b, b1b = _fold_conv_bn(params["dc2"]["conv1"], groups_split=cup)
    w2a, b2a = _fold_conv_bn(params["dc1"]["conv2"])
    w2b, b2b = _fold_conv_bn(params["dc2"]["conv2"])
    return {"w1": jnp.stack([w1a, w1b]), "b1": jnp.stack([b1a, b1b]),
            "w2": jnp.stack([w2a, w2b]), "b2": jnp.stack([b2a, b2b])}


# ----------------------------------------------------------------------------
# DualStreamUp forward
# ----------------------------------------------------------------------------
def dual_stream_up_forward(folded, x1_1, x1_2, x2_1, x2_2):
    n, cup = x1_1.shape[0], x1_1.shape[1]
    csk, hs, ws = x1_2.shape[1], x1_2.shape[2], x1_2.shape[3]
    assert x2_1.shape == x1_1.shape and x2_2.shape == x1_2.shape
    wp = ws + 2
    fp = (hs + 3) * wp

    # Both streams' planes through the fused separable upsample kernel; the
    # result lands directly in the zero-padded conv-input layout.
    xu = bilinear_up2x_to_padded(jnp.concatenate([x1_1, x2_1], axis=0), hs, ws)
    xu = xu.reshape(2, n, cup, fp)                              # free reshape

    # Skip connections into the same layout (one fused XLA stack+pad+cast).
    xs = jnp.stack([x1_2, x2_2], axis=0)
    xs = jnp.pad(xs, ((0, 0), (0, 0), (0, 0), (1, 2), (1, 1))).astype(jnp.bfloat16)
    xs = xs.reshape(2, n, csk, fp)

    # conv1: dual input groups (upsampled, skip) -> bf16 padded-layout output.
    h1 = conv3x3_bn_relu([xu, xs], (cup, csk), folded["w1"], folded["b1"],
                         hs, ws, jnp.bfloat16)
    # conv2: consumes h1 directly (no slice / re-pad), f32 output.
    h2 = conv3x3_bn_relu([h1], (h1.shape[2],), folded["w2"], folded["b2"],
                         hs, ws, jnp.float32)

    out = h2.reshape(2, n, h2.shape[2], hs + 3, wp)[..., 1:hs + 1, 1:ws + 1]
    return out[0], out[1]


# ----------------------------------------------------------------------------
# Deterministic parameter init (synthetic; shapes match the PyTorch module)
# ----------------------------------------------------------------------------
def _make_conv_bn(key, cin, cout):
    ks = jax.random.split(key, 6)
    w = jax.random.normal(ks[0], (cout, cin, 3, 3), jnp.float32) * 0.1
    b = jax.random.normal(ks[1], (cout,), jnp.float32) * 0.1
    gamma = jax.random.uniform(ks[2], (cout,), jnp.float32, 0.5, 1.5)
    beta = jax.random.normal(ks[3], (cout,), jnp.float32) * 0.1
    mean = jax.random.normal(ks[4], (cout,), jnp.float32) * 0.1
    var = jax.random.uniform(ks[5], (cout,), jnp.float32, 0.5, 1.5)
    return (w, b, gamma, beta, mean, var)


def make_params(key, in_channels, out_channels):
    mid_channels = in_channels // 2
    k1, k2, k3, k4 = jax.random.split(key, 4)
    return {
        "dc1": {"conv1": _make_conv_bn(k1, in_channels, mid_channels),
                "conv2": _make_conv_bn(k2, mid_channels, out_channels)},
        "dc2": {"conv1": _make_conv_bn(k3, in_channels, mid_channels),
                "conv2": _make_conv_bn(k4, mid_channels, out_channels)},
    }


if __name__ == "__main__":
    key = jax.random.PRNGKey(0)
    in_channels, out_channels = 8, 4
    B, H, W = 2, 16, 16

    params = make_params(key, in_channels, out_channels)
    folded = prepare_folded_params(params, in_channels)     # BN folding outside jit

    kx = jax.random.split(key, 5)
    # Deeper-layer features (pre-upsample): half channels, half spatial.
    x1_1 = jax.random.normal(kx[1], (B, in_channels // 2, H // 2, W // 2), jnp.float32)
    x1_2 = jax.random.normal(kx[2], (B, in_channels // 2, H, W), jnp.float32)
    x2_1 = jax.random.normal(kx[3], (B, in_channels // 2, H // 2, W // 2), jnp.float32)
    x2_2 = jax.random.normal(kx[4], (B, in_channels // 2, H, W), jnp.float32)

    fwd = jax.jit(dual_stream_up_forward)
    out1, out2 = fwd(folded, x1_1, x1_2, x2_1, x2_2)
    jax.block_until_ready((out1, out2))

    assert out1.shape == (B, out_channels, H, W), out1.shape
    assert out2.shape == (B, out_channels, H, W), out2.shape
    print("KERNEL_OK")
</pallas_src>

<mosaic_0001>
module attributes {stable_mosaic.version = 11 : i64} {
  func.func @_bilinear_up_kernel(%arg0: i32, %arg1: i32, %arg2: memref<1x1x8x8xf32, #tpu.memory_space<vmem>>, %arg3: memref<8x16xbf16, #tpu.memory_space<vmem>>, %arg4: memref<16x8xbf16, #tpu.memory_space<vmem>>, %arg5: memref<1x1x19x18xbf16, #tpu.memory_space<vmem>>) attributes {dimension_semantics = [#tpu.dimension_semantics<parallel>, #tpu.dimension_semantics<parallel>], iteration_bounds = array<i64: 4, 4>, scalar_prefetch = 0 : i64, scratch_operands = 0 : i64, tpu.core_type = #tpu.core_type<tc>, window_params = [{transform_indices = @transform_0, window_bounds = array<i64: 1, 1, 8, 8>}, {pipeline_mode = #tpu.pipeline_mode<synchronous>, transform_indices = @transform_1, window_bounds = array<i64: 8, 16>}, {pipeline_mode = #tpu.pipeline_mode<synchronous>, transform_indices = @transform_2, window_bounds = array<i64: 16, 8>}, {transform_indices = @transform_3, window_bounds = array<i64: 1, 1, 19, 18>}]} {
    %c0 = arith.constant 0 : index
    %c0_0 = arith.constant 0 : index
    %c0_1 = arith.constant 0 : index
    %c0_2 = arith.constant 0 : index
    %0 = vector.load %arg2[%c0, %c0_0, %c0_1, %c0_2] : memref<1x1x8x8xf32, #tpu.memory_space<vmem>>, vector<1x1x8x8xf32>
    %1 = vector.shape_cast %0 : vector<1x1x8x8xf32> to vector<8x8xf32>
    %2 = arith.truncf %1 : vector<8x8xf32> to vector<8x8xbf16>
    %c0_3 = arith.constant 0 : index
    %c0_4 = arith.constant 0 : index
    %3 = vector.load %arg3[%c0_3, %c0_4] : memref<8x16xbf16, #tpu.memory_space<vmem>>, vector<8x16xbf16>
    %cst = arith.constant dense<0.000000e+00> : vector<8x16xf32>
    %4 = tpu.matmul %2, %3, %cst {dimension_numbers = #tpu.dot_dimension_numbers<[1], [0], [0], [1], [0, 0, 1, 1], [], []>} : vector<8x8xbf16>, vector<8x16xbf16>, vector<8x16xf32> -> vector<8x16xf32>
    %c0_5 = arith.constant 0 : index
    %c0_6 = arith.constant 0 : index
    %5 = vector.load %arg4[%c0_5, %c0_6] : memref<16x8xbf16, #tpu.memory_space<vmem>>, vector<16x8xbf16>
    %6 = arith.truncf %4 : vector<8x16xf32> to vector<8x16xbf16>
    %cst_7 = arith.constant dense<0.000000e+00> : vector<16x16xf32>
    %7 = tpu.matmul %5, %6, %cst_7 {dimension_numbers = #tpu.dot_dimension_numbers<[1], [0], [0], [1], [0, 0, 1, 1], [], []>} : vector<16x8xbf16>, vector<8x16xbf16>, vector<16x16xf32> -> vector<16x16xf32>
    %cst_8 = arith.constant 0.000000e+00 : bf16
    %8 = vector.broadcast %cst_8 : bf16 to vector<19x18xbf16>
    %c0_9 = arith.constant 0 : index
    %c0_10 = arith.constant 0 : index
    %c0_11 = arith.constant 0 : index
    %c0_12 = arith.constant 0 : index
    %9 = vector.load %arg5[%c0_9, %c0_10, %c0_11, %c0_12] : memref<1x1x19x18xbf16, #tpu.memory_space<vmem>>, vector<1x1x19x18xbf16>
    %10 = vector.shape_cast %9 : vector<1x1x19x18xbf16> to vector<19x18xbf16>
    %11 = vector.shape_cast %8 : vector<19x18xbf16> to vector<1x1x19x18xbf16>
    tpu.vector_store %arg5[%c0_9, %c0_10, %c0_11, %c0_12], %11 {strides = array<i32>} : memref<1x1x19x18xbf16, #tpu.memory_space<vmem>>, vector<1x1x19x18xbf16>,
    %12 = arith.truncf %7 : vector<16x16xf32> to vector<16x16xbf16>
    %c0_13 = arith.constant 0 : index
    %c0_14 = arith.constant 0 : index
    %c1 = arith.constant 1 : index
    %c1_15 = arith.constant 1 : index
    %13 = vector.load %arg5[%c0_13, %c0_14, %c1, %c1_15] : memref<1x1x19x18xbf16, #tpu.memory_space<vmem>>, vector<1x1x16x16xbf16>
    %14 = vector.shape_cast %13 : vector<1x1x16x16xbf16> to vector<16x16xbf16>
    %15 = vector.shape_cast %12 : vector<16x16xbf16> to vector<1x1x16x16xbf16>
    tpu.vector_store %arg5[%c0_13, %c0_14, %c1, %c1_15], %15 {strides = array<i32>} : memref<1x1x19x18xbf16, #tpu.memory_space<vmem>>, vector<1x1x16x16xbf16>,
    return
  }
  func.func @transform_0(%arg0: i32, %arg1: i32) -> (i32, i32, i32, i32) {
    %c0_i32 = arith.constant 0 : i32
    %c0_i32_0 = arith.constant 0 : i32
    %c0_i32_1 = arith.constant 0 : i32
    return %arg0, %arg1, %c0_i32, %c0_i32_0 : i32, i32, i32, i32
  }
  func.func @transform_1(%arg0: i32, %arg1: i32) -> (i32, i32) {
    %c0_i32 = arith.constant 0 : i32
    %c0_i32_0 = arith.constant 0 : i32
    %c0_i32_1 = arith.constant 0 : i32
    return %c0_i32, %c0_i32_0 : i32, i32
  }
  func.func @transform_2(%arg0: i32, %arg1: i32) -> (i32, i32) {
    %c0_i32 = arith.constant 0 : i32
    %c0_i32_0 = arith.constant 0 : i32
    %c0_i32_1 = arith.constant 0 : i32
    return %c0_i32, %c0_i32_0 : i32, i32
  }
  func.func @transform_3(%arg0: i32, %arg1: i32) -> (i32, i32, i32, i32) {
    %c0_i32 = arith.constant 0 : i32
    %c0_i32_0 = arith.constant 0 : i32
    %c0_i32_1 = arith.constant 0 : i32
    return %arg0, %arg1, %c0_i32, %c0_i32_0 : i32, i32, i32, i32
  }
}

module attributes {stable_mosaic.version = 11 : i64} {
  func.func @_conv3x3_bn_relu_kernel(%arg0: i32, %arg1: i32, %arg2: memref<1x1x4x342xbf16, #tpu.memory_space<vmem>>, %arg3: memref<1x1x4x342xbf16, #tpu.memory_space<vmem>>, %arg4: memref<1x4x72xbf16, #tpu.memory_space<vmem>>, %arg5: memref<1x4x1xf32, #tpu.memory_space<vmem>>, %arg6: memref<1x288xf32, #tpu.memory_space<vmem>>, %arg7: memref<1x1x4x342xbf16, #tpu.memory_space<vmem>>, %arg8: memref<72x288xbf16, #tpu.memory_space<vmem>>) attributes {dimension_semantics = [#tpu.dimension_semantics<parallel>, #tpu.dimension_semantics<parallel>], iteration_bounds = array<i64: 2, 2>, scalar_prefetch = 0 : i64, scratch_operands = 1 : i64, tpu.core_type = #tpu.core_type<tc>, window_params = [{transform_indices = @transform_0, window_bounds = array<i64: 1, 1, 4, 342>}, {transform_indices = @transform_1, window_bounds = array<i64: 1, 1, 4, 342>}, {transform_indices = @transform_2, window_bounds = array<i64: 1, 4, 72>}, {transform_indices = @transform_3, window_bounds = array<i64: 1, 4, 1>}, {pipeline_mode = #tpu.pipeline_mode<synchronous>, transform_indices = @transform_4, window_bounds = array<i64: 1, 288>}, {transform_indices = @transform_5, window_bounds = array<i64: 1, 1, 4, 342>}]} {
    %c0 = arith.constant 0 : index
    %c0_0 = arith.constant 0 : index
    %c0_1 = arith.constant 0 : index
    %c0_2 = arith.constant 0 : index
    %0 = vector.load %arg2[%c0, %c0_0, %c0_1, %c0_2] : memref<1x1x4x342xbf16, #tpu.memory_space<vmem>>, vector<1x1x4x288xbf16>
    %1 = vector.shape_cast %0 : vector<1x1x4x288xbf16> to vector<4x288xbf16>
    %c0_3 = arith.constant 0 : index
    %c0_4 = arith.constant 0 : index
    %2 = vector.load %arg8[%c0_3, %c0_4] : memref<72x288xbf16, #tpu.memory_space<vmem>>, vector<4x288xbf16>
    tpu.vector_store %arg8[%c0_3, %c0_4], %1 {strides = array<i32>} : memref<72x288xbf16, #tpu.memory_space<vmem>>, vector<4x288xbf16>,
    %c0_5 = arith.constant 0 : index
    %c0_6 = arith.constant 0 : index
    %c0_7 = arith.constant 0 : index
    %c1 = arith.constant 1 : index
    %3 = vector.load %arg2[%c0_5, %c0_6, %c0_7, %c1] : memref<1x1x4x342xbf16, #tpu.memory_space<vmem>>, vector<1x1x4x288xbf16>
    %4 = vector.shape_cast %3 : vector<1x1x4x288xbf16> to vector<4x288xbf16>
    %c4 = arith.constant 4 : index
    %c0_8 = arith.constant 0 : index
    %5 = vector.load %arg8[%c4, %c0_8] : memref<72x288xbf16, #tpu.memory_space<vmem>>, vector<4x288xbf16>
    tpu.vector_store %arg8[%c4, %c0_8], %4 {strides = array<i32>} : memref<72x288xbf16, #tpu.memory_space<vmem>>, vector<4x288xbf16>,
    %c0_9 = arith.constant 0 : index
    %c0_10 = arith.constant 0 : index
    %c0_11 = arith.constant 0 : index
    %c2 = arith.constant 2 : index
    %6 = vector.load %arg2[%c0_9, %c0_10, %c0_11, %c2] : memref<1x1x4x342xbf16, #tpu.memory_space<vmem>>, vector<1x1x4x288xbf16>
    %7 = vector.shape_cast %6 : vector<1x1x4x288xbf16> to vector<4x288xbf16>
    %c8 = arith.constant 8 : index
    %c0_12 = arith.constant 0 : index
    %8 = vector.load %arg8[%c8, %c0_12] : memref<72x288xbf16, #tpu.memory_space<vmem>>, vector<4x288xbf16>
    tpu.vector_store %arg8[%c8, %c0_12], %7 {strides = array<i32>} : memref<72x288xbf16, #tpu.memory_space<vmem>>, vector<4x288xbf16>,
    %c0_13 = arith.constant 0 : index
    %c0_14 = arith.constant 0 : index
    %c0_15 = arith.constant 0 : index
    %c18 = arith.constant 18 : index
    %9 = vector.load %arg2[%c0_13, %c0_14, %c0_15, %c18] : memref<1x1x4x342xbf16, #tpu.memory_space<vmem>>, vector<1x1x4x288xbf16>
    %10 = vector.shape_cast %9 : vector<1x1x4x288xbf16> to vector<4x288xbf16>
    %c12 = arith.constant 12 : index
    %c0_16 = arith.constant 0 : index
    %11 = vector.load %arg8[%c12, %c0_16] : memref<72x288xbf16, #tpu.memory_space<vmem>>, vector<4x288xbf16>
    tpu.vector_store %arg8[%c12, %c0_16], %10 {strides = array<i32>} : memref<72x288xbf16, #tpu.memory_space<vmem>>, vector<4x288xbf16>,
    %c0_17 = arith.constant 0 : index
    %c0_18 = arith.constant 0 : index
    %c0_19 = arith.constant 0 : index
    %c19 = arith.constant 19 : index
    %12 = vector.load %arg2[%c0_17, %c0_18, %c0_19, %c19] : memref<1x1x4x342xbf16, #tpu.memory_space<vmem>>, vector<1x1x4x288xbf16>
    %13 = vector.shape_cast %12 : vector<1x1x4x288xbf16> to vector<4x288xbf16>
    %c16 = arith.constant 16 : index
    %c0_20 = arith.constant 0 : index
    %14 = vector.load %arg8[%c16, %c0_20] : memref<72x288xbf16, #tpu.memory_space<vmem>>, vector<4x288xbf16>
    tpu.vector_store %arg8[%c16, %c0_20], %13 {strides = array<i32>} : memref<72x288xbf16, #tpu.memory_space<vmem>>, vector<4x288xbf16>,
    %c0_21 = arith.constant 0 : index
    %c0_22 = arith.constant 0 : index
    %c0_23 = arith.constant 0 : index
    %c20 = arith.constant 20 : index
    %15 = vector.load %arg2[%c0_21, %c0_22, %c0_23, %c20] : memref<1x1x4x342xbf16, #tpu.memory_space<vmem>>, vector<1x1x4x288xbf16>
    %16 = vector.shape_cast %15 : vector<1x1x4x288xbf16> to vector<4x288xbf16>
    %c20_24 = arith.constant 20 : index
    %c0_25 = arith.constant 0 : index
    %17 = vector.load %arg8[%c20_24, %c0_25] : memref<72x288xbf16, #tpu.memory_space<vmem>>, vector<4x288xbf16>
    tpu.vector_store %arg8[%c20_24, %c0_25], %16 {strides = array<i32>} : memref<72x288xbf16, #tpu.memory_space<vmem>>, vector<4x288xbf16>,
    %c0_26 = arith.constant 0 : index
    %c0_27 = arith.constant 0 : index
    %c0_28 = arith.constant 0 : index
    %c36 = arith.constant 36 : index
    %18 = vector.load %arg2[%c0_26, %c0_27, %c0_28, %c36] : memref<1x1x4x342xbf16, #tpu.memory_space<vmem>>, vector<1x1x4x288xbf16>
    %19 = vector.shape_cast %18 : vector<1x1x4x288xbf16> to vector<4x288xbf16>
    %c24 = arith.constant 24 : index
    %c0_29 = arith.constant 0 : index
    %20 = vector.load %arg8[%c24, %c0_29] : memref<72x288xbf16, #tpu.memory_space<vmem>>, vector<4x288xbf16>
    tpu.vector_store %arg8[%c24, %c0_29], %19 {strides = array<i32>} : memref<72x288xbf16, #tpu.memory_space<vmem>>, vector<4x288xbf16>,
    %c0_30 = arith.constant 0 : index
    %c0_31 = arith.constant 0 : index
    %c0_32 = arith.constant 0 : index
    %c37 = arith.constant 37 : index
    %21 = vector.load %arg2[%c0_30, %c0_31, %c0_32, %c37] : memref<1x1x4x342xbf16, #tpu.memory_space<vmem>>, vector<1x1x4x288xbf16>
    %22 = vector.shape_cast %21 : vector<1x1x4x288xbf16> to vector<4x288xbf16>
    %c28 = arith.constant 28 : index
    %c0_33 = arith.constant 0 : index
    %23 = vector.load %arg8[%c28, %c0_33] : memref<72x288xbf16, #tpu.memory_space<vmem>>, vector<4x288xbf16>
    tpu.vector_store %arg8[%c28, %c0_33], %22 {strides = array<i32>} : memref<72x288xbf16, #tpu.memory_space<vmem>>, vector<4x288xbf16>,
    %c0_34 = arith.constant 0 : index
    %c0_35 = arith.constant 0 : index
    %c0_36 = arith.constant 0 : index
    %c38 = arith.constant 38 : index
    %24 = vector.load %arg2[%c0_34, %c0_35, %c0_36, %c38] : memref<1x1x4x342xbf16, #tpu.memory_space<vmem>>, vector<1x1x4x288xbf16>
    %25 = vector.shape_cast %24 : vector<1x1x4x288xbf16> to vector<4x288xbf16>
    %c32 = arith.constant 32 : index
    %c0_37 = arith.constant 0 : index
    %26 = vector.load %arg8[%c32, %c0_37] : memref<72x288xbf16, #tpu.memory_space<vmem>>, vector<4x288xbf16>
    tpu.vector_store %arg8[%c32, %c0_37], %25 {strides = array<i32>} : memref<72x288xbf16, #tpu.memory_space<vmem>>, vector<4x288xbf16>,
    %c0_38 = arith.constant 0 : index
    %c0_39 = arith.constant 0 : index
    %c0_40 = arith.constant 0 : index
    %c0_41 = arith.constant 0 : index
    %27 = vector.load %arg3[%c0_38, %c0_39, %c0_40, %c0_41] : memref<1x1x4x342xbf16, #tpu.memory_space<vmem>>, vector<1x1x4x288xbf16>
    %28 = vector.shape_cast %27 : vector<1x1x4x288xbf16> to vector<4x288xbf16>
    %c36_42 = arith.constant 36 : index
    %c0_43 = arith.constant 0 : index
    %29 = vector.load %arg8[%c36_42, %c0_43] : memref<72x288xbf16, #tpu.memory_space<vmem>>, vector<4x288xbf16>
    tpu.vector_store %arg8[%c36_42, %c0_43], %28 {strides = array<i32>} : memref<72x288xbf16, #tpu.memory_space<vmem>>, vector<4x288xbf16>,
    %c0_44 = arith.constant 0 : index
    %c0_45 = arith.constant 0 : index
    %c0_46 = arith.constant 0 : index
    %c1_47 = arith.constant 1 : index
    %30 = vector.load %arg3[%c0_44, %c0_45, %c0_46, %c1_47] : memref<1x1x4x342xbf16, #tpu.memory_space<vmem>>, vector<1x1x4x288xbf16>
    %31 = vector.shape_cast %30 : vector<1x1x4x288xbf16> to vector<4x288xbf16>
    %c40 = arith.constant 40 : index
    %c0_48 = arith.constant 0 : index
    %32 = vector.load %arg8[%c40, %c0_48] : memref<72x288xbf16, #tpu.memory_space<vmem>>, vector<4x288xbf16>
    tpu.vector_store %arg8[%c40, %c0_48], %31 {strides = array<i32>} : memref<72x288xbf16, #tpu.memory_space<vmem>>, vector<4x288xbf16>,
    %c0_49 = arith.constant 0 : index
    %c0_50 = arith.constant 0 : index
    %c0_51 = arith.constant 0 : index
    %c2_52 = arith.constant 2 : index
    %33 = vector.load %arg3[%c0_49, %c0_50, %c0_51, %c2_52] : memref<1x1x4x342xbf16, #tpu.memory_space<vmem>>, vector<1x1x4x288xbf16>
    %34 = vector.shape_cast %33 : vector<1x1x4x288xbf16> to vector<4x288xbf16>
    %c44 = arith.constant 44 : index
    %c0_53 = arith.constant 0 : index
    %35 = vector.load %arg8[%c44, %c0_53] : memref<72x288xbf16, #tpu.memory_space<vmem>>, vector<4x288xbf16>
    tpu.vector_store %arg8[%c44, %c0_53], %34 {strides = array<i32>} : memref<72x288xbf16, #tpu.memory_space<vmem>>, vector<4x288xbf16>,
    %c0_54 = arith.constant 0 : index
    %c0_55 = arith.constant 0 : index
    %c0_56 = arith.constant 0 : index
    %c18_57 = arith.constant 18 : index
    %36 = vector.load %arg3[%c0_54, %c0_55, %c0_56, %c18_57] : memref<1x1x4x342xbf16, #tpu.memory_space<vmem>>, vector<1x1x4x288xbf16>
    %37 = vector.shape_cast %36 : vector<1x1x4x288xbf16> to vector<4x288xbf16>
    %c48 = arith.constant 48 : index
    %c0_58 = arith.constant 0 : index
    %38 = vector.load %arg8[%c48, %c0_58] : memref<72x288xbf16, #tpu.memory_space<vmem>>, vector<4x288xbf16>
    tpu.vector_store %arg8[%c48, %c0_58], %37 {strides = array<i32>} : memref<72x288xbf16, #tpu.memory_space<vmem>>, vector<4x288xbf16>,
    %c0_59 = arith.constant 0 : index
    %c0_60 = arith.constant 0 : index
    %c0_61 = arith.constant 0 : index
    %c19_62 = arith.constant 19 : index
    %39 = vector.load %arg3[%c0_59, %c0_60, %c0_61, %c19_62] : memref<1x1x4x342xbf16, #tpu.memory_space<vmem>>, vector<1x1x4x288xbf16>
    %40 = vector.shape_cast %39 : vector<1x1x4x288xbf16> to vector<4x288xbf16>
    %c52 = arith.constant 52 : index
    %c0_63 = arith.constant 0 : index
    %41 = vector.load %arg8[%c52, %c0_63] : memref<72x288xbf16, #tpu.memory_space<vmem>>, vector<4x288xbf16>
    tpu.vector_store %arg8[%c52, %c0_63], %40 {strides = array<i32>} : memref<72x288xbf16, #tpu.memory_space<vmem>>, vector<4x288xbf16>,
    %c0_64 = arith.constant 0 : index
    %c0_65 = arith.constant 0 : index
    %c0_66 = arith.constant 0 : index
    %c20_67 = arith.constant 20 : index
    %42 = vector.load %arg3[%c0_64, %c0_65, %c0_66, %c20_67] : memref<1x1x4x342xbf16, #tpu.memory_space<vmem>>, vector<1x1x4x288xbf16>
    %43 = vector.shape_cast %42 : vector<1x1x4x288xbf16> to vector<4x288xbf16>
    %c56 = arith.constant 56 : index
    %c0_68 = arith.constant 0 : index
    %44 = vector.load %arg8[%c56, %c0_68] : memref<72x288xbf16, #tpu.memory_space<vmem>>, vector<4x288xbf16>
    tpu.vector_store %arg8[%c56, %c0_68], %43 {strides = array<i32>} : memref<72x288xbf16, #tpu.memory_space<vmem>>, vector<4x288xbf16>,
    %c0_69 = arith.constant 0 : index
    %c0_70 = arith.constant 0 : index
    %c0_71 = arith.constant 0 : index
    %c36_72 = arith.constant 36 : index
    %45 = vector.load %arg3[%c0_69, %c0_70, %c0_71, %c36_72] : memref<1x1x4x342xbf16, #tpu.memory_space<vmem>>, vector<1x1x4x288xbf16>
    %46 = vector.shape_cast %45 : vector<1x1x4x288xbf16> to vector<4x288xbf16>
    %c60 = arith.constant 60 : index
    %c0_73 = arith.constant 0 : index
    %47 = vector.load %arg8[%c60, %c0_73] : memref<72x288xbf16, #tpu.memory_space<vmem>>, vector<4x288xbf16>
    tpu.vector_store %arg8[%c60, %c0_73], %46 {strides = array<i32>} : memref<72x288xbf16, #tpu.memory_space<vmem>>, vector<4x288xbf16>,
    %c0_74 = arith.constant 0 : index
    %c0_75 = arith.constant 0 : index
    %c0_76 = arith.constant 0 : index
    %c37_77 = arith.constant 37 : index
    %48 = vector.load %arg3[%c0_74, %c0_75, %c0_76, %c37_77] : memref<1x1x4x342xbf16, #tpu.memory_space<vmem>>, vector<1x1x4x288xbf16>
    %49 = vector.shape_cast %48 : vector<1x1x4x288xbf16> to vector<4x288xbf16>
    %c64 = arith.constant 64 : index
    %c0_78 = arith.constant 0 : index
    %50 = vector.load %arg8[%c64, %c0_78] : memref<72x288xbf16, #tpu.memory_space<vmem>>, vector<4x288xbf16>
    tpu.vector_store %arg8[%c64, %c0_78], %49 {strides = array<i32>} : memref<72x288xbf16, #tpu.memory_space<vmem>>, vector<4x288xbf16>,
    %c0_79 = arith.constant 0 : index
    %c0_80 = arith.constant 0 : index
    %c0_81 = arith.constant 0 : index
    %c38_82 = arith.constant 38 : index
    %51 = vector.load %arg3[%c0_79, %c0_80, %c0_81, %c38_82] : memref<1x1x4x342xbf16, #tpu.memory_space<vmem>>, vector<1x1x4x288xbf16>
    %52 = vector.shape_cast %51 : vector<1x1x4x288xbf16> to vector<4x288xbf16>
    %c68 = arith.constant 68 : index
    %c0_83 = arith.constant 0 : index
    %53 = vector.load %arg8[%c68, %c0_83] : memref<72x288xbf16, #tpu.memory_space<vmem>>, vector<4x288xbf16>
    tpu.vector_store %arg8[%c68, %c0_83], %52 {strides = array<i32>} : memref<72x288xbf16, #tpu.memory_space<vmem>>, vector<4x288xbf16>,
    %c0_84 = arith.constant 0 : index
    %c0_85 = arith.constant 0 : index
    %c0_86 = arith.constant 0 : index
    %54 = vector.load %arg4[%c0_84, %c0_85, %c0_86] : memref<1x4x72xbf16, #tpu.memory_space<vmem>>, vector<1x4x72xbf16>
    %55 = vector.shape_cast %54 : vector<1x4x72xbf16> to vector<4x72xbf16>
    %c0_87 = arith.constant 0 : index
    %c0_88 = arith.constant 0 : index
    %56 = vector.load %arg8[%c0_87, %c0_88] : memref<72x288xbf16, #tpu.memory_space<vmem>>, vector<72x288xbf16>
    %cst = arith.constant dense<0.000000e+00> : vector<4x288xf32>
    %57 = tpu.matmul %55, %56, %cst {dimension_numbers = #tpu.dot_dimension_numbers<[1], [0], [0], [1], [0, 0, 1, 1], [], []>} : vector<4x72xbf16>, vector<72x288xbf16>, vector<4x288xf32> -> vector<4x288xf32>
    %c0_89 = arith.constant 0 : index
    %c0_90 = arith.constant 0 : index
    %c0_91 = arith.constant 0 : index
    %58 = vector.load %arg5[%c0_89, %c0_90, %c0_91] : memref<1x4x1xf32, #tpu.memory_space<vmem>>, vector<1x4x1xf32>
    %59 = vector.shape_cast %58 : vector<1x4x1xf32> to vector<4x1xf32>
    %60 = vector.broadcast %59 : vector<4x1xf32> to vector<4x288xf32>
    %61 = arith.addf %57, %60 : vector<4x288xf32>
    %cst_92 = arith.constant 0.000000e+00 : f32
    %62 = vector.broadcast %cst_92 : f32 to vector<4x288xf32>
    %63 = arith.maximumf %61, %62 : vector<4x288xf32>
    %c0_93 = arith.constant 0 : index
    %c0_94 = arith.constant 0 : index
    %64 = vector.load %arg6[%c0_93, %c0_94] : memref<1x288xf32, #tpu.memory_space<vmem>>, vector<1x288xf32>
    %65 = vector.broadcast %64 : vector<1x288xf32> to vector<4x288xf32>
    %66 = arith.mulf %63, %65 : vector<4x288xf32>
    %cst_95 = arith.constant 0.000000e+00 : bf16
    %67 = vector.broadcast %cst_95 : bf16 to vector<4x19xbf16>
    %c0_96 = arith.constant 0 : index
    %c0_97 = arith.constant 0 : index
    %c0_98 = arith.constant 0 : index
    %c0_99 = arith.constant 0 : index
    %68 = vector.load %arg7[%c0_96, %c0_97, %c0_98, %c0_99] : memref<1x1x4x342xbf16, #tpu.memory_space<vmem>>, vector<1x1x4x19xbf16>
    %69 = vector.shape_cast %68 : vector<1x1x4x19xbf16> to vector<4x19xbf16>
    %70 = vector.shape_cast %67 : vector<4x19xbf16> to vector<1x1x4x19xbf16>
    tpu.vector_store %arg7[%c0_96, %c0_97, %c0_98, %c0_99], %70 {strides = array<i32>} : memref<1x1x4x342xbf16, #tpu.memory_space<vmem>>, vector<1x1x4x19xbf16>,
    %71 = arith.truncf %66 : vector<4x288xf32> to vector<4x288xbf16>
    %c0_100 = arith.constant 0 : index
    %c0_101 = arith.constant 0 : index
    %c0_102 = arith.constant 0 : index
    %c19_103 = arith.constant 19 : index
    %72 = vector.load %arg7[%c0_100, %c0_101, %c0_102, %c19_103] : memref<1x1x4x342xbf16, #tpu.memory_space<vmem>>, vector<1x1x4x288xbf16>
    %73 = vector.shape_cast %72 : vector<1x1x4x288xbf16> to vector<4x288xbf16>
    %74 = vector.shape_cast %71 : vector<4x288xbf16> to vector<1x1x4x288xbf16>
    tpu.vector_store %arg7[%c0_100, %c0_101, %c0_102, %c19_103], %74 {strides = array<i32>} : memref<1x1x4x342xbf16, #tpu.memory_space<vmem>>, vector<1x1x4x288xbf16>,
    %cst_104 = arith.constant 0.000000e+00 : bf16
    %75 = vector.broadcast %cst_104 : bf16 to vector<4x35xbf16>
    %c0_105 = arith.constant 0 : index
    %c0_106 = arith.constant 0 : index
    %c0_107 = arith.constant 0 : index
    %c307 = arith.constant 307 : index
    %76 = vector.load %arg7[%c0_105, %c0_106, %c0_107, %c307] : memref<1x1x4x342xbf16, #tpu.memory_space<vmem>>, vector<1x1x4x35xbf16>
    %77 = vector.shape_cast %76 : vector<1x1x4x35xbf16> to vector<4x35xbf16>
    %78 = vector.shape_cast %75 : vector<4x35xbf16> to vector<1x1x4x35xbf16>
    tpu.vector_store %arg7[%c0_105, %c0_106, %c0_107, %c307], %78 {strides = array<i32>} : memref<1x1x4x342xbf16, #tpu.memory_space<vmem>>, vector<1x1x4x35xbf16>,
    return
  }
  func.func @transform_0(%arg0: i32, %arg1: i32) -> (i32, i32, i32, i32) {
    %c0_i32 = arith.constant 0 : i32
    %c0_i32_0 = arith.constant 0 : i32
    %c0_i32_1 = arith.constant 0 : i32
    return %arg0, %arg1, %c0_i32, %c0_i32_0 : i32, i32, i32, i32
  }
  func.func @transform_1(%arg0: i32, %arg1: i32) -> (i32, i32, i32, i32) {
    %c0_i32 = arith.constant 0 : i32
    %c0_i32_0 = arith.constant 0 : i32
    %c0_i32_1 = arith.constant 0 : i32
    return %arg0, %arg1, %c0_i32, %c0_i32_0 : i32, i32, i32, i32
  }
  func.func @transform_2(%arg0: i32, %arg1: i32) -> (i32, i32, i32) {
    %c0_i32 = arith.constant 0 : i32
    %c0_i32_0 = arith.constant 0 : i32
    %c0_i32_1 = arith.constant 0 : i32
    return %arg0, %c0_i32, %c0_i32_0 : i32, i32, i32
  }
  func.func @transform_3(%arg0: i32, %arg1: i32) -> (i32, i32, i32) {
    %c0_i32 = arith.constant 0 : i32
    %c0_i32_0 = arith.constant 0 : i32
    %c0_i32_1 = arith.constant 0 : i32
    return %arg0, %c0_i32, %c0_i32_0 : i32, i32, i32
  }
  func.func @transform_4(%arg0: i32, %arg1: i32) -> (i32, i32) {
    %c0_i32 = arith.constant 0 : i32
    %c0_i32_0 = arith.constant 0 : i32
    %c0_i32_1 = arith.constant 0 : i32
    return %c0_i32, %c0_i32_0 : i32, i32
  }
  func.func @transform_5(%arg0: i32, %arg1: i32) -> (i32, i32, i32, i32) {
    %c0_i32 = arith.constant 0 : i32
    %c0_i32_0 = arith.constant 0 : i32
    %c0_i32_1 = arith.constant 0 : i32
    return %arg0, %arg1, %c0_i32, %c0_i32_0 : i32, i32, i32, i32
  }
}

module attributes {stable_mosaic.version = 11 : i64} {
  func.func @_conv3x3_bn_relu_kernel(%arg0: i32, %arg1: i32, %arg2: memref<1x1x4x342xbf16, #tpu.memory_space<vmem>>, %arg3: memref<1x4x36xbf16, #tpu.memory_space<vmem>>, %arg4: memref<1x4x1xf32, #tpu.memory_space<vmem>>, %arg5: memref<1x288xf32, #tpu.memory_space<vmem>>, %arg6: memref<1x1x4x342xf32, #tpu.memory_space<vmem>>, %arg7: memref<36x288xbf16, #tpu.memory_space<vmem>>) attributes {dimension_semantics = [#tpu.dimension_semantics<parallel>, #tpu.dimension_semantics<parallel>], iteration_bounds = array<i64: 2, 2>, scalar_prefetch = 0 : i64, scratch_operands = 1 : i64, tpu.core_type = #tpu.core_type<tc>, window_params = [{transform_indices = @transform_0, window_bounds = array<i64: 1, 1, 4, 342>}, {transform_indices = @transform_1, window_bounds = array<i64: 1, 4, 36>}, {transform_indices = @transform_2, window_bounds = array<i64: 1, 4, 1>}, {pipeline_mode = #tpu.pipeline_mode<synchronous>, transform_indices = @transform_3, window_bounds = array<i64: 1, 288>}, {transform_indices = @transform_4, window_bounds = array<i64: 1, 1, 4, 342>}]} {
    %c0 = arith.constant 0 : index
    %c0_0 = arith.constant 0 : index
    %c0_1 = arith.constant 0 : index
    %c0_2 = arith.constant 0 : index
    %0 = vector.load %arg2[%c0, %c0_0, %c0_1, %c0_2] : memref<1x1x4x342xbf16, #tpu.memory_space<vmem>>, vector<1x1x4x288xbf16>
    %1 = vector.shape_cast %0 : vector<1x1x4x288xbf16> to vector<4x288xbf16>
    %c0_3 = arith.constant 0 : index
    %c0_4 = arith.constant 0 : index
    %2 = vector.load %arg7[%c0_3, %c0_4] : memref<36x288xbf16, #tpu.memory_space<vmem>>, vector<4x288xbf16>
    tpu.vector_store %arg7[%c0_3, %c0_4], %1 {strides = array<i32>} : memref<36x288xbf16, #tpu.memory_space<vmem>>, vector<4x288xbf16>,
    %c0_5 = arith.constant 0 : index
    %c0_6 = arith.constant 0 : index
    %c0_7 = arith.constant 0 : index
    %c1 = arith.constant 1 : index
    %3 = vector.load %arg2[%c0_5, %c0_6, %c0_7, %c1] : memref<1x1x4x342xbf16, #tpu.memory_space<vmem>>, vector<1x1x4x288xbf16>
    %4 = vector.shape_cast %3 : vector<1x1x4x288xbf16> to vector<4x288xbf16>
    %c4 = arith.constant 4 : index
    %c0_8 = arith.constant 0 : index
    %5 = vector.load %arg7[%c4, %c0_8] : memref<36x288xbf16, #tpu.memory_space<vmem>>, vector<4x288xbf16>
    tpu.vector_store %arg7[%c4, %c0_8], %4 {strides = array<i32>} : memref<36x288xbf16, #tpu.memory_space<vmem>>, vector<4x288xbf16>,
    %c0_9 = arith.constant 0 : index
    %c0_10 = arith.constant 0 : index
    %c0_11 = arith.constant 0 : index
    %c2 = arith.constant 2 : index
    %6 = vector.load %arg2[%c0_9, %c0_10, %c0_11, %c2] : memref<1x1x4x342xbf16, #tpu.memory_space<vmem>>, vector<1x1x4x288xbf16>
    %7 = vector.shape_cast %6 : vector<1x1x4x288xbf16> to vector<4x288xbf16>
    %c8 = arith.constant 8 : index
    %c0_12 = arith.constant 0 : index
    %8 = vector.load %arg7[%c8, %c0_12] : memref<36x288xbf16, #tpu.memory_space<vmem>>, vector<4x288xbf16>
    tpu.vector_store %arg7[%c8, %c0_12], %7 {strides = array<i32>} : memref<36x288xbf16, #tpu.memory_space<vmem>>, vector<4x288xbf16>,
    %c0_13 = arith.constant 0 : index
    %c0_14 = arith.constant 0 : index
    %c0_15 = arith.constant 0 : index
    %c18 = arith.constant 18 : index
    %9 = vector.load %arg2[%c0_13, %c0_14, %c0_15, %c18] : memref<1x1x4x342xbf16, #tpu.memory_space<vmem>>, vector<1x1x4x288xbf16>
    %10 = vector.shape_cast %9 : vector<1x1x4x288xbf16> to vector<4x288xbf16>
    %c12 = arith.constant 12 : index
    %c0_16 = arith.constant 0 : index
    %11 = vector.load %arg7[%c12, %c0_16] : memref<36x288xbf16, #tpu.memory_space<vmem>>, vector<4x288xbf16>
    tpu.vector_store %arg7[%c12, %c0_16], %10 {strides = array<i32>} : memref<36x288xbf16, #tpu.memory_space<vmem>>, vector<4x288xbf16>,
    %c0_17 = arith.constant 0 : index
    %c0_18 = arith.constant 0 : index
    %c0_19 = arith.constant 0 : index
    %c19 = arith.constant 19 : index
    %12 = vector.load %arg2[%c0_17, %c0_18, %c0_19, %c19] : memref<1x1x4x342xbf16, #tpu.memory_space<vmem>>, vector<1x1x4x288xbf16>
    %13 = vector.shape_cast %12 : vector<1x1x4x288xbf16> to vector<4x288xbf16>
    %c16 = arith.constant 16 : index
    %c0_20 = arith.constant 0 : index
    %14 = vector.load %arg7[%c16, %c0_20] : memref<36x288xbf16, #tpu.memory_space<vmem>>, vector<4x288xbf16>
    tpu.vector_store %arg7[%c16, %c0_20], %13 {strides = array<i32>} : memref<36x288xbf16, #tpu.memory_space<vmem>>, vector<4x288xbf16>,
    %c0_21 = arith.constant 0 : index
    %c0_22 = arith.constant 0 : index
    %c0_23 = arith.constant 0 : index
    %c20 = arith.constant 20 : index
    %15 = vector.load %arg2[%c0_21, %c0_22, %c0_23, %c20] : memref<1x1x4x342xbf16, #tpu.memory_space<vmem>>, vector<1x1x4x288xbf16>
    %16 = vector.shape_cast %15 : vector<1x1x4x288xbf16> to vector<4x288xbf16>
    %c20_24 = arith.constant 20 : index
    %c0_25 = arith.constant 0 : index
    %17 = vector.load %arg7[%c20_24, %c0_25] : memref<36x288xbf16, #tpu.memory_space<vmem>>, vector<4x288xbf16>
    tpu.vector_store %arg7[%c20_24, %c0_25], %16 {strides = array<i32>} : memref<36x288xbf16, #tpu.memory_space<vmem>>, vector<4x288xbf16>,
    %c0_26 = arith.constant 0 : index
    %c0_27 = arith.constant 0 : index
    %c0_28 = arith.constant 0 : index
    %c36 = arith.constant 36 : index
    %18 = vector.load %arg2[%c0_26, %c0_27, %c0_28, %c36] : memref<1x1x4x342xbf16, #tpu.memory_space<vmem>>, vector<1x1x4x288xbf16>
    %19 = vector.shape_cast %18 : vector<1x1x4x288xbf16> to vector<4x288xbf16>
    %c24 = arith.constant 24 : index
    %c0_29 = arith.constant 0 : index
    %20 = vector.load %arg7[%c24, %c0_29] : memref<36x288xbf16, #tpu.memory_space<vmem>>, vector<4x288xbf16>
    tpu.vector_store %arg7[%c24, %c0_29], %19 {strides = array<i32>} : memref<36x288xbf16, #tpu.memory_space<vmem>>, vector<4x288xbf16>,
    %c0_30 = arith.constant 0 : index
    %c0_31 = arith.constant 0 : index
    %c0_32 = arith.constant 0 : index
    %c37 = arith.constant 37 : index
    %21 = vector.load %arg2[%c0_30, %c0_31, %c0_32, %c37] : memref<1x1x4x342xbf16, #tpu.memory_space<vmem>>, vector<1x1x4x288xbf16>
    %22 = vector.shape_cast %21 : vector<1x1x4x288xbf16> to vector<4x288xbf16>
    %c28 = arith.constant 28 : index
    %c0_33 = arith.constant 0 : index
    %23 = vector.load %arg7[%c28, %c0_33] : memref<36x288xbf16, #tpu.memory_space<vmem>>, vector<4x288xbf16>
    tpu.vector_store %arg7[%c28, %c0_33], %22 {strides = array<i32>} : memref<36x288xbf16, #tpu.memory_space<vmem>>, vector<4x288xbf16>,
    %c0_34 = arith.constant 0 : index
    %c0_35 = arith.constant 0 : index
    %c0_36 = arith.constant 0 : index
    %c38 = arith.constant 38 : index
    %24 = vector.load %arg2[%c0_34, %c0_35, %c0_36, %c38] : memref<1x1x4x342xbf16, #tpu.memory_space<vmem>>, vector<1x1x4x288xbf16>
    %25 = vector.shape_cast %24 : vector<1x1x4x288xbf16> to vector<4x288xbf16>
    %c32 = arith.constant 32 : index
    %c0_37 = arith.constant 0 : index
    %26 = vector.load %arg7[%c32, %c0_37] : memref<36x288xbf16, #tpu.memory_space<vmem>>, vector<4x288xbf16>
    tpu.vector_store %arg7[%c32, %c0_37], %25 {strides = array<i32>} : memref<36x288xbf16, #tpu.memory_space<vmem>>, vector<4x288xbf16>,
    %c0_38 = arith.constant 0 : index
    %c0_39 = arith.constant 0 : index
    %c0_40 = arith.constant 0 : index
    %27 = vector.load %arg3[%c0_38, %c0_39, %c0_40] : memref<1x4x36xbf16, #tpu.memory_space<vmem>>, vector<1x4x36xbf16>
    %28 = vector.shape_cast %27 : vector<1x4x36xbf16> to vector<4x36xbf16>
    %c0_41 = arith.constant 0 : index
    %c0_42 = arith.constant 0 : index
    %29 = vector.load %arg7[%c0_41, %c0_42] : memref<36x288xbf16, #tpu.memory_space<vmem>>, vector<36x288xbf16>
    %cst = arith.constant dense<0.000000e+00> : vector<4x288xf32>
    %30 = tpu.matmul %28, %29, %cst {dimension_numbers = #tpu.dot_dimension_numbers<[1], [0], [0], [1], [0, 0, 1, 1], [], []>} : vector<4x36xbf16>, vector<36x288xbf16>, vector<4x288xf32> -> vector<4x288xf32>
    %c0_43 = arith.constant 0 : index
    %c0_44 = arith.constant 0 : index
    %c0_45 = arith.constant 0 : index
    %31 = vector.load %arg4[%c0_43, %c0_44, %c0_45] : memref<1x4x1xf32, #tpu.memory_space<vmem>>, vector<1x4x1xf32>
    %32 = vector.shape_cast %31 : vector<1x4x1xf32> to vector<4x1xf32>
    %33 = vector.broadcast %32 : vector<4x1xf32> to vector<4x288xf32>
    %34 = arith.addf %30, %33 : vector<4x288xf32>
    %cst_46 = arith.constant 0.000000e+00 : f32
    %35 = vector.broadcast %cst_46 : f32 to vector<4x288xf32>
    %36 = arith.maximumf %34, %35 : vector<4x288xf32>
    %c0_47 = arith.constant 0 : index
    %c0_48 = arith.constant 0 : index
    %37 = vector.load %arg5[%c0_47, %c0_48] : memref<1x288xf32, #tpu.memory_space<vmem>>, vector<1x288xf32>
    %38 = vector.broadcast %37 : vector<1x288xf32> to vector<4x288xf32>
    %39 = arith.mulf %36, %38 : vector<4x288xf32>
    %cst_49 = arith.constant 0.000000e+00 : f32
    %40 = vector.broadcast %cst_49 : f32 to vector<4x19xf32>
    %c0_50 = arith.constant 0 : index
    %c0_51 = arith.constant 0 : index
    %c0_52 = arith.constant 0 : index
    %c0_53 = arith.constant 0 : index
    %41 = vector.load %arg6[%c0_50, %c0_51, %c0_52, %c0_53] : memref<1x1x4x342xf32, #tpu.memory_space<vmem>>, vector<1x1x4x19xf32>
    %42 = vector.shape_cast %41 : vector<1x1x4x19xf32> to vector<4x19xf32>
    %43 = vector.shape_cast %40 : vector<4x19xf32> to vector<1x1x4x19xf32>
    tpu.vector_store %arg6[%c0_50, %c0_51, %c0_52, %c0_53], %43 {strides = array<i32>} : memref<1x1x4x342xf32, #tpu.memory_space<vmem>>, vector<1x1x4x19xf32>,
    %c0_54 = arith.constant 0 : index
    %c0_55 = arith.constant 0 : index
    %c0_56 = arith.constant 0 : index
    %c19_57 = arith.constant 19 : index
    %44 = vector.load %arg6[%c0_54, %c0_55, %c0_56, %c19_57] : memref<1x1x4x342xf32, #tpu.memory_space<vmem>>, vector<1x1x4x288xf32>
    %45 = vector.shape_cast %44 : vector<1x1x4x288xf32> to vector<4x288xf32>
    %46 = vector.shape_cast %39 : vector<4x288xf32> to vector<1x1x4x288xf32>
    tpu.vector_store %arg6[%c0_54, %c0_55, %c0_56, %c19_57], %46 {strides = array<i32>} : memref<1x1x4x342xf32, #tpu.memory_space<vmem>>, vector<1x1x4x288xf32>,
    %cst_58 = arith.constant 0.000000e+00 : f32
    %47 = vector.broadcast %cst_58 : f32 to vector<4x35xf32>
    %c0_59 = arith.constant 0 : index
    %c0_60 = arith.constant 0 : index
    %c0_61 = arith.constant 0 : index
    %c307 = arith.constant 307 : index
    %48 = vector.load %arg6[%c0_59, %c0_60, %c0_61, %c307] : memref<1x1x4x342xf32, #tpu.memory_space<vmem>>, vector<1x1x4x35xf32>
    %49 = vector.shape_cast %48 : vector<1x1x4x35xf32> to vector<4x35xf32>
    %50 = vector.shape_cast %47 : vector<4x35xf32> to vector<1x1x4x35xf32>
    tpu.vector_store %arg6[%c0_59, %c0_60, %c0_61, %c307], %50 {strides = array<i32>} : memref<1x1x4x342xf32, #tpu.memory_space<vmem>>, vector<1x1x4x35xf32>,
    return
  }
  func.func @transform_0(%arg0: i32, %arg1: i32) -> (i32, i32, i32, i32) {
    %c0_i32 = arith.constant 0 : i32
    %c0_i32_0 = arith.constant 0 : i32
    %c0_i32_1 = arith.constant 0 : i32
    return %arg0, %arg1, %c0_i32, %c0_i32_0 : i32, i32, i32, i32
  }
  func.func @transform_1(%arg0: i32, %arg1: i32) -> (i32, i32, i32) {
    %c0_i32 = arith.constant 0 : i32
    %c0_i32_0 = arith.constant 0 : i32
    %c0_i32_1 = arith.constant 0 : i32
    return %arg0, %c0_i32, %c0_i32_0 : i32, i32, i32
  }
  func.func @transform_2(%arg0: i32, %arg1: i32) -> (i32, i32, i32) {
    %c0_i32 = arith.constant 0 : i32
    %c0_i32_0 = arith.constant 0 : i32
    %c0_i32_1 = arith.constant 0 : i32
    return %arg0, %c0_i32, %c0_i32_0 : i32, i32, i32
  }
  func.func @transform_3(%arg0: i32, %arg1: i32) -> (i32, i32) {
    %c0_i32 = arith.constant 0 : i32
    %c0_i32_0 = arith.constant 0 : i32
    %c0_i32_1 = arith.constant 0 : i32
    return %c0_i32, %c0_i32_0 : i32, i32
  }
  func.func @transform_4(%arg0: i32, %arg1: i32) -> (i32, i32, i32, i32) {
    %c0_i32 = arith.constant 0 : i32
    %c0_i32_0 = arith.constant 0 : i32
    %c0_i32_1 = arith.constant 0 : i32
    return %arg0, %arg1, %c0_i32, %c0_i32_0 : i32, i32, i32, i32
  }
}

</mosaic_0001>

<bundles_post_ra>
// kernel: dual_stream_up_forward.3
= control target key start
LH: loop header
LB: loop body
LE: loop exit
PB: predicated region body
PF: predicated region fallthrough
CT: control target
= control target key end

     0   :  { %s604_s12 = smov 0   ;;  %s606_s13 = smov 0   ;;  %s676_s0 = inlined_call_operand.vmem [shape: f32[4,4,8,8], index: 0, kind: input, shape index: {}]   ;;  %s677_s1 = inlined_call_operand.vmem [shape: bf16[8,16], index: 1, kind: input, shape index: {}]   ;;  %s678_s2 = inlined_call_operand.vmem [shape: bf16[16,8], index: 2, kind: input, shape index: {}]   ;;  %s679_s3 = inlined_call_operand.vmem [shape: bf16[4,4,19,18], index: 3, kind: output, shape index: {}]  }
   0x1   :  { %s608_s14 = smov 0   ;;  %s610_s15 = smov 0  }
   0x2   :  { %s612_s16 = smov 0  }
   0x3 LB: > { %s22_s17 = sadd.s32 1, %s570_s14  ;;  %s25_s18 = sadd.s32 1, %s574_s15  ;;  %s578_s16 = sphi %s612_s16, %s13_s16   ;;  %s574_s15 = sphi %s610_s15, %s683_s15   ;;  %s570_s14 = sphi %s608_s14, %s682_s14   ;;  %s566_s13 = sphi %s606_s13, %s681_s13   ;;  %s562_s12 = sphi %s604_s12, %s680_s12  }
   0x4   : > { %p23_p0 = scmp.ge.s32.totalorder %s22_s17, 4  ;;  %p464_p1 = scmp.ge.s32.totalorder %s578_s16, 1 }
   0x5   : > { %p156_p2 = scmp.lt.s32.totalorder %s578_s16, 17 }
   0x6   : > { %s685_s17 = smov (%p23_p0, %s22_s17), 0  ;;  %s687_s18 = smov (!%p23_p0, %s25_s18), %s574_s15 }
   0x7   : > { %p157_p3 = pnand %p464_p1, %p156_p2  ;;  %p27_p4 = scmp.ge.s32.totalorder %s687_s18, 4 }
   0x8   : > { %v207_v0 = vld [vmem:[%s677_s1] sm:$0xf] (!%p157_p3)  ;;  %vm212_vm0 = vcmask (!%p157_p3), 1043456   ;;  %p187_p5 = scmp.lt.s32.totalorder (!%p157_p3), %s566_s13, 3  ;;  %v580_v1 = vmov (!%p157_p3), 0.0   ;;  %vm581_vm1 = vmmov (!%p157_p3), 0  }
   0x9   : > { %s689_s18 = smov (%p27_p4, %s687_s18), 0  ;;  %160 = sbr.rel (%p157_p3) target bundleno = 583 (0x247), region = 32 }
   0xa   : > { %481 = vmatprep.subr.bf16.mxu0 (!%p157_p3), %v580_v1  ;;  %v214_v2 = vsel (!%p157_p3), %vm212_vm0, %v207_v0, 0  ;;  %483 = vmatprep.mubr.msk.bf16.mxu0 (!%p157_p3), %vm581_vm1, %v580_v1  ;;  %p189_p6 = scmp.lt.s32.totalorder (!%p157_p3), %s562_s12, 3  ;;  %vm208_vm2 = vcmask (!%p157_p3), 64512   ;;  %v539_v11 = vld [vmem:[%s678_s2] sm:$0xff] (!%p157_p3)   ;;  %vm311_vm3 = vcmask (!%p157_p3), 142336   ;;  %v582_v12 = vmov (!%p157_p3), 0  }
   0xb   : > { %482 = vmatpush3.bf16.msra.mxu0 (!%p157_p3), %v214_v2  ;;  %487 = vmatprep.subr.bf16.mxu1 (!%p157_p3), %v580_v1  ;;  %vm314_vm4 = vcmask (!%p157_p3), 140288   ;;  %vm315_vm5 = vsmask.f32 (!%p157_p3), 1280  ;;  %vm326_vm7 = vsmask.f32 (!%p157_p3), 256  ;;  %s583_s9 = smov (!%p157_p3), 1  }
   0xc   : > { %489 = vmatprep.mubr.msk.bf16.mxu1 (!%p157_p3), %vm581_vm1, %v580_v1  ;;  %vm316_vm6 = vmand (!%p157_p3), %vm314_vm4, %vm315_vm5  ;;  %vm327_vm8 = vsmask.f32 (!%p157_p3), 4368  ;;  %vm355_vm10 = vcmask (!%p157_p3), 134152   ;;  %vm356_vm11 = vsmask.f32 (!%p157_p3), 7938  ;;  %vm363_vm13 = vcmask (!%p157_p3), 131080  }
   0xd   : > { %vm328_vm9 = vmor (!%p157_p3), %vm326_vm7, %vm327_vm8 }
   0xe   : > { %vm357_vm12 = vmand (!%p157_p3), %vm355_vm10, %vm356_vm11 }
   0xf   : > { %vm364_vm14 = vmand (!%p157_p3), %vm363_vm13, %vm326_vm7 }
  0x10   : > { %s691_s13 = smov (!%p187_p5, %s566_s13), 3  ;;  %s693_s12 = smov (!%p189_p6, %s562_s12), 3 }
  0x11   : > { %s465_s21 = sshll.u32 %s691_s13, 2  ;;  %s494_s22 = smul.u32 12, %s691_s13 }
  0x12   : > { %s192_s23 = sadd.s32 %s465_s21, %s693_s12  ;;  %s493_s24 = smul.u32 3, %s693_s12 }
  0x13   : > { %s466_s25 = sshll.u32 %s192_s23, 3 }
  0x14   : > { %s194_s28 = scalar_lea.vmem %s676_s0, %s466_s25  ;;  %s201_s29 = sadd.s32 %s494_s22, %s493_s24 }
  0x15   : > { %v205_v3 = vld [vmem:[%s194_s28] sm:$0xff]  ;;  %s467_s5 = sshll.u32 %s201_s29, 2 }
  0x16   : > { %v206_v4 = vpack.c.bf16 %v205_v3, %v205_v3  ;;  %s648_s8 = scalar_lea.vmem %s679_s3, %s467_s5 }
  0x17   : > { %312 = vst.msk [vmem:[%s648_s8] sm:$0xf] %vm311_vm3, %v582_v12  ;;  %313 = vst.msk [vmem:[%s648_s8 + $0x4] sm:$0xf] %vm311_vm3, %v582_v12  ;;  %v317_v13 = vld [vmem:[%s648_s8 + $0x8] sm:$0x3] }
  0x18   : > { %484 = vmatmul.mubr.msk.bf16.vlgmr.msra.gmra.mrb[0].mxu0 %vm208_vm2, %v206_v4  ;;  %v318_v14 = vsel %vm316_vm6, 0, %v317_v13 }
  0x19   : > { %319 = vst [vmem:[%s648_s8 + $0x8] sm:$0x3] %v318_v14 }
  0x1e   : > { %v358_v32 = vld [vmem:[%s648_s8] sm:$0xf] }
  0x20   : > { %v365_v35 = vld [vmem:[%s648_s8 + $0x8] sm:$0x1] }
  0xeb   : > { %v250_v5 = vpop.f32.mrb[0].mxu0 }
  0xec   : > { %v258_v6 = vpack.c.bf16 %v250_v5, %v250_v5  ;;  %v485_v7 = vpop.f32.mrb[1].mxu0 }
  0xed   : > { %v253_v8 = vpop.f32.mrb[2].mxu0 }
  0xee   : > { %v486_v9 = vpop.f32.mrb[3].mxu0  ;;  %v268_v10 = vsel %vm212_vm0, %v258_v6, 0 }
  0xef   : > { %488 = vmatpush3.bf16.msra.mxu1 %v268_v10 }
  0xf2   : > { %490 = vmatmul.mubr.msk.bf16.vlgmr.msra.gmra.mrb[0].mxu1 %vm208_vm2, %v539_v11 }
 0x1c5   : > { %v304_v15 = vpop.f32.mrb[0].mxu1 }
 0x1c6   : > { %v475_v16 = vpack.c.bf16 %v304_v15, %v304_v15  ;;  %v491_v17 = vpop.f32.mrb[1].mxu1 }
 0x1c7   : > { %v307_v18 = vpop.f32.mrb[2].mxu1 }
 0x1c8   : > { %v330_v19 = vshrl.u32 %v475_v16, 16  ;;  %v476_v20 = vpack.c.bf16 %v307_v18, %v307_v18  ;;  %v492_v21 = vpop.f32.mrb[3].mxu1  ;;  %v333_v23 = vshll.u32 %v475_v16, 16 }
 0x1ca   : > { %v332_v22 = vrot.slane %v330_v19, 7  ;;  %v338_v24 = vshrl.u32 %v476_v20, 16  ;;  %v341_v26 = vshll.u32 %v476_v20, 16 }
 0x1cc   : > { %v340_v25 = vrot.slane %v338_v24, 7  ;;  %v335_v27 = vor.u32 %v333_v23, %v332_v22  ;;  %v336_v29 = vrot.slane %v332_v22, 4 }
 0x1ce   : > { %v343_v28 = vor.u32 %v341_v26, %v340_v25  ;;  %346 = vrot.lane.b32.xlu0 %v335_v27, %s583_s9  ;;  %v345_v31 = vrot.slane %v340_v25, 4 }
 0x1d0   : > { %v344_v30 = vsel %vm328_vm9, %v336_v29, %v343_v28 }
 0x1d1   : > { %348 = vrot.lane.b32.xlu1 %v344_v30, %s583_s9 }
 0x1d2   : > { %350 = vrot.lane.b32.xlu0 %v345_v31, %s583_s9 }
 0x240   : > { %v347_v33 = vpop.permute.xlu0 %346 }
 0x241   : > { %v359_v34 = vsel %vm357_vm12, %v347_v33, %v358_v32 }
 0x242   : > { %360 = vst [vmem:[%s648_s8] sm:$0xf] %v359_v34 }
 0x243   : > { %v349_v36 = vpop.permute.xlu1 %348 }
 0x244   : > { %362 = vst.msk [vmem:[%s648_s8 + $0x4] sm:$0xf] %vm355_vm10, %v349_v36  ;;  %v351_v37 = vpop.permute.xlu0 %350 }
 0x245   : > { %v366_v38 = vsel %vm364_vm14, %v351_v37, %v365_v35 }
 0x246   : > { %367 = vst [vmem:[%s648_s8 + $0x8] sm:$0x1] %v366_v38 }
 0x247 PF: > { %s13_s16 = sadd.s32 1, %s578_s16   ;;  %s680_s12 = smov %s570_s14 }
 0x248   : > { %p10_p7 = scmp.ge.s32.totalorder %s13_s16, 18   ;;  %s681_s13 = smov %s574_s15 }
 0x249   : > { %s682_s14 = smov %s685_s17  ;;  %s683_s15 = smov %s689_s18 }
 0x24a   :  { %12 = sbr.rel (!%p10_p7) target bundleno = 3 (0x3), region = 62 }

// kernel: dual_stream_up_forward.4
= control target key start
LH: loop header
LB: loop body
LE: loop exit
PB: predicated region body
PF: predicated region fallthrough
CT: control target
= control target key end

     0   :  { %s1465_s18 = smov 0   ;;  %s1467_s19 = smov 0   ;;  %s1703_s0 = inlined_call_operand.vmem [shape: bf16[2,2,4,342], index: 0, kind: input, shape index: {}]   ;;  %s1704_s1 = inlined_call_operand.vmem [shape: bf16[2,2,4,342], index: 1, kind: input, shape index: {}]   ;;  %s1705_s2 = inlined_call_operand.vmem [shape: bf16[2,4,72], index: 2, kind: input, shape index: {}]   ;;  %s1706_s3 = inlined_call_operand.vmem [shape: f32[2,4,1], index: 3, kind: input, shape index: {}]   ;;  %s1707_s4 = inlined_call_operand.vmem [shape: f32[1,288], index: 4, kind: input, shape index: {}]   ;;  %s1708_s5 = inlined_call_operand.vmem [shape: bf16[2,2,4,342], index: 5, kind: output, shape index: {}]  }
   0x1   :  { %s1469_s20 = smov 0   ;;  %s1471_s21 = smov 0  }
   0x2   :  { %s1473_s22 = smov 0  }
   0x3 LB: > { %s24_s23 = sadd.s32 1, %s1412_s20  ;;  %s27_s24 = sadd.s32 1, %s1416_s21  ;;  %s1420_s22 = sphi %s1473_s22, %s15_s22   ;;  %s1416_s21 = sphi %s1471_s21, %s1712_s21   ;;  %s1412_s20 = sphi %s1469_s20, %s1711_s20   ;;  %s1408_s19 = sphi %s1467_s19, %s1710_s19   ;;  %s1404_s18 = sphi %s1465_s18, %s1709_s18  }
   0x4   : > { %p25_p0 = scmp.ge.s32.totalorder %s24_s23, 2  ;;  %p1244_p1 = scmp.ge.s32.totalorder %s1420_s22, 1 }
   0x5   : > { %p241_p2 = scmp.lt.s32.totalorder %s1420_s22, 5 }
   0x6   : > { %s1714_s23 = smov (%p25_p0, %s24_s23), 0  ;;  %s1716_s24 = smov (!%p25_p0, %s27_s24), %s1416_s21 }
   0x7   : > { %p242_p3 = pnand %p1244_p1, %p241_p2  ;;  %p29_p4 = scmp.ge.s32.totalorder %s1716_s24, 2 }
   0x8   : > { %p294_p5 = scmp.lt.s32.totalorder (!%p242_p3), %s1408_s19, 1  ;;  %p296_p6 = scmp.lt.s32.totalorder (!%p242_p3), %s1404_s18, 1  ;;  %v343_v0 = vlaneseq (!%p242_p3)  ;;  %v1422_v1 = vmov (!%p242_p3), 1983009808   ;;  %vm350_vm0 = vcmask (!%p242_p3), 254976   ;;  %v1427_v28 = vmov (!%p242_p3), 0.0  }
   0x9   : > { %s1718_s24 = smov (%p29_p4, %s1716_s24), 0  ;;  %245 = sbr.rel (%p242_p3) target bundleno = 565 (0x235), region = 40 }
   0xa   : > { %v341_v2 = vunpack.c.l.s4 (!%p242_p3), %v1422_v1  ;;  %v1497_v4 = vshrl.u32 (!%p242_p3), %v343_v0, 7  ;;  %s1423_s7 = smov (!%p242_p3), 126   ;;  %s1424_s8 = smov (!%p242_p3), 127   ;;  %1279 = vmatprep.subr.bf16.mxu1 (!%p242_p3), %v1427_v28  ;;  %vm382_vm1 = vcmask (!%p242_p3), 257026   ;;  %vm1432_vm2 = vmmov (!%p242_p3), 0  }
   0xb   : > { %s1425_s9 = smov (!%p242_p3), 110   ;;  %s1426_s10 = smov (!%p242_p3), 109   ;;  %1289 = vmatprep.mubr.msk.bf16.mxu1 (!%p242_p3), %vm1432_vm2, %v1427_v28  ;;  %vm1062_vm3 = vcmask (!%p242_p3), 148480   ;;  %vm375_vm4 = vcmask (!%p242_p3), 1043456   ;;  %vm408_vm5 = vcmask (!%p242_p3), 1031168   ;;  %vm377_vm6 = vcmask (!%p242_p3), 1039360  }
   0xc   : > { %v342_v3 = vunpack.c.0.s8 (!%p242_p3), %v341_v2  ;;  %s1428_s14 = smov (!%p242_p3), 108   ;;  %s1429_s15 = smov (!%p242_p3), 92   ;;  %vm468_vm7 = vcmask (!%p242_p3), 891904   ;;  %vm438_vm8 = vcmask (!%p242_p3), 900096   ;;  %vm498_vm9 = vcmask (!%p242_p3), 883712  }
   0xd   : > { %s1430_s16 = smov (!%p242_p3), 91   ;;  %s1431_s17 = smov (!%p242_p3), 90   ;;  %vm528_vm10 = vcmask (!%p242_p3), 752640   ;;  %vm558_vm11 = vcmask (!%p242_p3), 744448   ;;  %vm588_vm12 = vcmask (!%p242_p3), 736256   ;;  %vm944_vm13 = vcmask (!%p242_p3), 588800  }
   0xe   : > { %v1501_v5 = vsub.s32 (!%p242_p3), %v342_v3, %v1497_v4  ;;  %s1434_s11 = smov (!%p242_p3), 19   ;;  %vm1092_vm14 = vcmask (!%p242_p3), 1041560   ;;  %vm1093_vm15 = vcmask (!%p242_p3), 1043458   ;;  %vm1089_vm2 = vcmask (!%p242_p3), 154624  }
  0x10   : > { %s1720_s19 = smov (!%p294_p5, %s1408_s19), 1  ;;  %s1722_s18 = smov (!%p296_p6, %s1404_s18), 1 }
  0x11   : > { %s1294_s25 = smul.u32 6, %s1720_s19 }
  0x12   : > { %s1293_s26 = smul.u32 3, %s1722_s18 }
  0x14   : > { %s300_s27 = sadd.s32 %s1294_s25, %s1293_s26 }
  0x15   : > { %s1503_s28 = sshll.u32 %s300_s27, 1  ;;  %s1248_s27 = sshll.u32 %s1720_s19, 2 }
  0x16   : > { %s1509_s6 = scalar_lea.vmem %s1703_s0, %s1503_s28  ;;  %s1537_s13 = scalar_lea.vmem %s1704_s1, %s1503_s28 }
  0x17   : > { %v384_v6 = vld [vmem:[%s1509_s6] sm:$0x3f]  ;;  %s1609_s26 = scalar_lea.vmem %s1708_s5, %s1503_s28  ;;  %s1247_s28 = sshll.u32 %s1720_s19, 1 }
  0x18   : > { %v352_v7 = vld [vmem:[%s1509_s6] sm:$0x3f]  ;;  %v393_v9 = vrot.slane %v384_v6, %v1501_v5  ;;  %v386_v12 = vcombine.high %v384_v6, %v384_v6 }
  0x19   : > { %v414_v8 = vld [vmem:[%s1509_s6] sm:$0x3f]  ;;  %v368_v10 = vrot.slane %v352_v7, %v1501_v5  ;;  %v354_v13 = vcombine.low %v352_v7, %v352_v7 }
  0x1a   : > { %v444_v11 = vld [vmem:[%s1509_s6] sm:$0x3f]  ;;  %401 = vrot.lane.b32.xlu1 %v393_v9, %s1423_s7  ;;  %v430_v14 = vrot.slane %v414_v8, %v1501_v5  ;;  %v400_v18 = vrot.slane %v386_v12, %v1501_v5  ;;  %v416_v20 = vcombine.low %v414_v8, %v414_v8 }
  0x1b   : > { %371 = vrot.lane.b32.xlu0 %v368_v10, %s1424_s8  ;;  %v453_v15 = vrot.slane %v444_v11, %v1501_v5  ;;  %v330_v16 = vld [vmem:[%s1509_s6] sm:$0x3f]  ;;  %v446_v17 = vcombine.high %v444_v11, %v444_v11  ;;  %v361_v19 = vrot.slane %v354_v13, %v1501_v5 }
  0x1c   : > { %1250 = vst.sshfl [vmem:[#allocation2] sm:$0xf pattern:$0x76325410] %v330_v16  ;;  %v474_v21 = vld [vmem:[%s1509_s6] sm:$0x3f]  ;;  %v423_v23 = vrot.slane %v416_v20, %v1501_v5  ;;  %v332_v26 = vcombine.high %v330_v16, %v330_v16 }
  0x1d   : > { %v460_v22 = vrot.slane %v446_v17, %v1501_v5  ;;  %v476_v24 = vcombine.low %v474_v21, %v474_v21  ;;  %v504_v25 = vld [vmem:[%s1509_s6] sm:$0x3f]  ;;  %v490_v27 = vrot.slane %v474_v21, %v1501_v5 }
  0x1e   : > { %433 = vrot.lane.b32.xlu1 %v430_v14, %s1425_s9  ;;  %v506_v30 = vcombine.high %v504_v25, %v504_v25  ;;  %v346_v31 = vrot.slane %v332_v26, %v1501_v5  ;;  %v594_v32 = vld [vmem:[%s1537_s13] sm:$0x3f]  ;;  %v513_v36 = vrot.slane %v504_v25, %v1501_v5 }
  0x1f   : > { %461 = vrot.lane.b32.xlu0 %v453_v15, %s1426_s10  ;;  %v483_v29 = vrot.slane %v476_v24, %v1501_v5  ;;  %v534_v33 = vld [vmem:[%s1509_s6] sm:$0x3f]  ;;  %v610_v34 = vrot.slane %v594_v32, %v1501_v5  ;;  %v596_v39 = vcombine.low %v594_v32, %v594_v32  ;;  %v1433_v15 = vmov 0  }
  0x20   : > { %351 = vst.msk [vmem:[#allocation2 + $0x8] sm:$0x3] %vm350_vm0, %v346_v31  ;;  %v520_v35 = vrot.slane %v506_v30, %v1501_v5  ;;  %v536_v37 = vcombine.low %v534_v33, %v534_v33  ;;  %v564_v38 = vld [vmem:[%s1509_s6] sm:$0x3f]  ;;  %v550_v40 = vrot.slane %v534_v33, %v1501_v5  ;;  %990 = vmatprep.mubr.bf16.mxu0 %v1433_v15  ;;  %s319_s6 = scalar_lea.vmem %s1706_s3, %s1248_s27 }
  0x21   : > { %614 = vst.msk [vmem:[#allocation2 + $0x38] sm:$0xc] %vm382_vm1, %v610_v34  ;;  %1251 = vst.sshfl [vmem:[#allocation2 + $0x30] sm:$0xf0 pattern:$0x76325410] %v596_v39  ;;  %v566_v42 = vcombine.high %v564_v38, %v564_v38  ;;  %v573_v45 = vrot.slane %v564_v38, %v1501_v5  ;;  %1348 = vset.pattern.permute.xlu0 %v1433_v15 }
  0x22   : > { %403 = vrot.lane.b32.xlu1 %v400_v18, %s1423_s7  ;;  %v543_v41 = vrot.slane %v536_v37, %v1501_v5  ;;  %v615_v43 = vld [vmem:[%s1537_s13] sm:$0x3f]  ;;  %1063 = vst.msk [vmem:[%s1609_s26] sm:$0x3] %vm1062_vm3, %v1433_v15 }
  0x23   : > { %369 = vrot.lane.b32.xlu0 %v361_v19, %s1424_s8  ;;  %v580_v44 = vrot.slane %v566_v42, %v1501_v5  ;;  %v617_v46 = vcombine.high %v615_v43, %v615_v43  ;;  %v644_v47 = vld [vmem:[%s1537_s13] sm:$0x3f]  ;;  %v624_v49 = vrot.slane %v615_v43, %v1501_v5 }
  0x24   : > { %v646_v50 = vcombine.low %v644_v47, %v644_v47  ;;  %v673_v51 = vld [vmem:[%s1537_s13] sm:$0x3f]  ;;  %v660_v52 = vrot.slane %v644_v47, %v1501_v5 }
  0x25   : > { %v631_v48 = vrot.slane %v617_v46, %v1501_v5  ;;  %v675_v54 = vcombine.high %v673_v51, %v673_v51  ;;  %v702_v55 = vld [vmem:[%s1537_s13] sm:$0x3f]  ;;  %v682_v57 = vrot.slane %v673_v51, %v1501_v5 }
  0x26   : > { %463 = vrot.lane.b32.xlu1 %v460_v22, %s1426_s10  ;;  %v653_v53 = vrot.slane %v646_v50, %v1501_v5  ;;  %v704_v58 = vcombine.low %v702_v55, %v702_v55  ;;  %v731_v59 = vld [vmem:[%s1537_s13] sm:$0x3f]  ;;  %v718_v60 = vrot.slane %v702_v55, %v1501_v5 }
  0x27   : > { %431 = vrot.lane.b32.xlu0 %v423_v23, %s1425_s9  ;;  %v689_v56 = vrot.slane %v675_v54, %v1501_v5  ;;  %v733_v62 = vcombine.high %v731_v59, %v731_v59  ;;  %v760_v63 = vld [vmem:[%s1537_s13] sm:$0x3f]  ;;  %v740_v1 = vrot.slane %v731_v59, %v1501_v5 }
  0x28   : > { %v711_v61 = vrot.slane %v704_v58, %v1501_v5  ;;  %v762_v2 = vcombine.low %v760_v63, %v760_v63  ;;  %v789_v3 = vld [vmem:[%s1537_s13] sm:$0x3f]  ;;  %v776_v6 = vrot.slane %v760_v63, %v1501_v5 }
  0x29   : > { %v747_v0 = vrot.slane %v733_v62, %v1501_v5  ;;  %v791_v8 = vcombine.high %v789_v3, %v789_v3  ;;  %v818_v9 = vld [vmem:[%s1537_s13] sm:$0x3f]  ;;  %v798_v11 = vrot.slane %v789_v3, %v1501_v5 }
  0x2a   : > { %493 = vrot.lane.b32.xlu1 %v490_v27, %s1428_s14  ;;  %v769_v7 = vrot.slane %v762_v2, %v1501_v5  ;;  %v820_v12 = vcombine.low %v818_v9, %v818_v9  ;;  %v834_v13 = vrot.slane %v818_v9, %v1501_v5  ;;  %v866_v16 = vld [vmem:[%s319_s6] sm:$0xf] }
  0x2b   : > { %491 = vrot.lane.b32.xlu0 %v483_v29, %s1428_s14  ;;  %v805_v10 = vrot.slane %v791_v8, %v1501_v5 }
  0x2c   : > { %v827_v14 = vrot.slane %v820_v12, %v1501_v5 }
  0x2e   : > { %523 = vrot.lane.b32.xlu1 %v520_v35, %s1429_s15 }
  0x2f   : > { %521 = vrot.lane.b32.xlu0 %v513_v36, %s1429_s15 }
  0x32   : > { %553 = vrot.lane.b32.xlu1 %v550_v40, %s1430_s16 }
  0x33   : > { %551 = vrot.lane.b32.xlu0 %v543_v41, %s1430_s16 }
  0x36   : > { %583 = vrot.lane.b32.xlu1 %v580_v44, %s1431_s17 }
  0x37   : > { %581 = vrot.lane.b32.xlu0 %v573_v45, %s1431_s17 }
  0x3a   : > { %634 = vrot.lane.b32.xlu1 %v631_v48, %s1424_s8 }
  0x3b   : > { %632 = vrot.lane.b32.xlu0 %v624_v49, %s1424_s8 }
  0x3e   : > { %663 = vrot.lane.b32.xlu1 %v660_v52, %s1423_s7 }
  0x3f   : > { %661 = vrot.lane.b32.xlu0 %v653_v53, %s1423_s7 }
  0x42   : > { %692 = vrot.lane.b32.xlu1 %v689_v56, %s1425_s9 }
  0x43   : > { %690 = vrot.lane.b32.xlu0 %v682_v57, %s1425_s9  ;;  %s315_s9 = scalar_lea.vmem %s1705_s2, %s1247_s28 }
  0x46   : > { %721 = vrot.lane.b32.xlu1 %v718_v60, %s1426_s10 }
  0x47   : > { %719 = vrot.lane.b32.xlu0 %v711_v61, %s1426_s10 }
  0x4a   : > { %750 = vrot.lane.b32.xlu1 %v747_v0, %s1428_s14 }
  0x4b   : > { %748 = vrot.lane.b32.xlu0 %v740_v1, %s1428_s14 }
  0x4e   : > { %779 = vrot.lane.b32.xlu1 %v776_v6, %s1429_s15 }
  0x4f   : > { %777 = vrot.lane.b32.xlu0 %v769_v7, %s1429_s15 }
  0x52   : > { %808 = vrot.lane.b32.xlu1 %v805_v10, %s1430_s16 }
  0x53   : > { %806 = vrot.lane.b32.xlu0 %v798_v11, %s1430_s16 }
  0x56   : > { %837 = vrot.lane.b32.xlu1 %v834_v13, %s1431_s17 }
  0x57   : > { %835 = vrot.lane.b32.xlu0 %v827_v14, %s1431_s17 }
  0x5b   : > { %869 = vperm.xlu0 %1348, %v866_v16  }
  0x8c   : > { %v402_v17 = vpop.permute.xlu1 %401 }
  0x8d   : > { %v372_v18 = vpop.permute.xlu0 %371  ;;  %v405_v23 = vrot.slane %v402_v17, 4 }
  0x8e   : > { %383 = vst.msk [vmem:[#allocation2 + $0x8] sm:$0xc] %vm382_vm1, %v372_v18  ;;  %v374_v24 = vrot.slane %v372_v18, 4 }
  0x90   : > { %v434_v19 = vpop.permute.xlu1 %433 }
  0x91   : > { %v462_v20 = vpop.permute.xlu0 %461  ;;  %443 = vst.msk [vmem:[#allocation2 + $0x14] sm:$0xc] %vm382_vm1, %v434_v19  ;;  %v436_v34 = vrot.slane %v434_v19, 4 }
  0x92   : > { %v465_v35 = vrot.slane %v462_v20, 4 }
  0x94   : > { %v404_v21 = vpop.permute.xlu1 %403 }
  0x95   : > { %v370_v22 = vpop.permute.xlu0 %369  ;;  %v406_v25 = vrot.slane %v404_v21, 4  ;;  %413 = vst.msk [vmem:[#allocation2 + $0x14] sm:$0x3] %vm350_vm0, %v404_v21 }
  0x96   : > { %v373_v26 = vrot.slane %v370_v22, 4 }
  0x97   : > { %v407_v27 = vsel %vm375_vm4, %v405_v23, %v406_v25 }
  0x98   : > { %v376_v29 = vsel %vm375_vm4, %v373_v26, %v374_v24  ;;  %v409_v30 = vsel %vm408_vm5, %v402_v17, %v407_v27  ;;  %v464_v32 = vpop.permute.xlu1 %463 }
  0x99   : > { %v378_v31 = vsel %vm377_vm6, %v370_v22, %v376_v29  ;;  %v432_v33 = vpop.permute.xlu0 %431  ;;  %412 = vst [vmem:[#allocation2 + $0xc] sm:$0x33] %v409_v30  ;;  %v466_v36 = vrot.slane %v464_v32, 4  ;;  %473 = vst.msk [vmem:[#allocation2 + $0x20] sm:$0x3] %vm350_vm0, %v464_v32 }
  0x9a   : > { %381 = vst [vmem:[#allocation2] sm:$0xcc] %v378_v31  ;;  %v435_v37 = vrot.slane %v432_v33, 4 }
  0x9b   : > { %v467_v38 = vsel %vm375_vm4, %v465_v35, %v466_v36 }
  0x9c   : > { %v437_v39 = vsel %vm375_vm4, %v435_v37, %v436_v34  ;;  %v469_v40 = vsel %vm468_vm7, %v462_v20, %v467_v38  ;;  %v494_v42 = vpop.permute.xlu1 %493  ;;  %v1366_v44 = vld [vmem:[#allocation2 + $0x8] ss:$12 sps:$4 sm:$0xff]  }
  0x9d   : > { %v439_v41 = vsel %vm438_vm8, %v432_v33, %v437_v39  ;;  %v492_v43 = vpop.permute.xlu0 %491  ;;  %472 = vst [vmem:[#allocation2 + $0x18] sm:$0x33] %v469_v40  ;;  %v496_v45 = vrot.slane %v494_v42, 4  ;;  %503 = vst.msk [vmem:[#allocation2 + $0x20] sm:$0xc] %vm382_vm1, %v494_v42  ;;  %1280 = vmatpush3.bf16.msra.mxu1 %v1366_v44 }
  0x9e   : > { %442 = vst [vmem:[#allocation2 + $0xc] sm:$0xcc] %v439_v41  ;;  %v495_v46 = vrot.slane %v492_v43, 4  ;;  %1281 = vmatprep.subr.bf16.mxu1 %v1427_v28 }
  0xa0   : > { %v497_v47 = vsel %vm375_vm4, %v495_v46, %v496_v45  ;;  %v524_v49 = vpop.permute.xlu1 %523 }
  0xa1   : > { %v499_v48 = vsel %vm498_vm9, %v492_v43, %v497_v47  ;;  %v522_v50 = vpop.permute.xlu0 %521  ;;  %v526_v51 = vrot.slane %v524_v49, 4  ;;  %533 = vst.msk [vmem:[#allocation2 + $0x2c] sm:$0x3] %vm350_vm0, %v524_v49  ;;  %v848_v54 = vld [vmem:[#allocation2] sm:$0xff] }
  0xa2   : > { %502 = vst [vmem:[#allocation2 + $0x18] sm:$0xcc] %v499_v48  ;;  %v525_v52 = vrot.slane %v522_v50, 4 }
  0xa4   : > { %v527_v53 = vsel %vm375_vm4, %v525_v52, %v526_v51  ;;  %v554_v56 = vpop.permute.xlu1 %553 }
  0xa5   : > { %v529_v55 = vsel %vm528_vm10, %v522_v50, %v527_v53  ;;  %v552_v57 = vpop.permute.xlu0 %551  ;;  %v850_v58 = vld [vmem:[#allocation2 + $0xc] sm:$0xff]  ;;  %v556_v60 = vrot.slane %v554_v56, 4  ;;  %563 = vst.msk [vmem:[#allocation2 + $0x2c] sm:$0xc] %vm382_vm1, %v554_v56 }
  0xa6   : > { %v1367_v59 = vld [vmem:[#allocation2 + $0x4] ss:$12 sps:$4 sm:$0xff]   ;;  %532 = vst [vmem:[#allocation2 + $0x24] sm:$0x33] %v529_v55  ;;  %v555_v61 = vrot.slane %v552_v57, 4  ;;  %v1252_v62 = vcombine.low %v848_v54, %v850_v58 }
  0xa7   : > { %958 = vmatprep.subr.bf16.mxu0 %v1367_v59 }
  0xa8   : > { %v557_v63 = vsel %vm375_vm4, %v555_v61, %v556_v60  ;;  %959 = vmatpush1.bf16.msra.mxu0 %v1252_v62  ;;  %v584_v1 = vpop.permute.xlu1 %583 }
  0xa9   : > { %v559_v0 = vsel %vm558_vm11, %v552_v57, %v557_v63  ;;  %v582_v2 = vpop.permute.xlu0 %581  ;;  %v586_v3 = vrot.slane %v584_v1, 4  ;;  %593 = vst.msk [vmem:[#allocation2 + $0x38] sm:$0x3] %vm350_vm0, %v584_v1  ;;  %v852_v16 = vld [vmem:[#allocation2 + $0x18] sm:$0xff] }
  0xaa   : > { %562 = vst [vmem:[#allocation2 + $0x24] sm:$0xcc] %v559_v0  ;;  %v585_v6 = vrot.slane %v582_v2, 4 }
  0xac   : > { %v587_v7 = vsel %vm375_vm4, %v585_v6, %v586_v3  ;;  %v635_v9 = vpop.permute.xlu1 %634  ;;  %v1369_v11 = vld [vmem:[#allocation2 + $0x20] ss:$12 sps:$4 sm:$0xff]  }
  0xad   : > { %v589_v8 = vsel %vm588_vm12, %v582_v2, %v587_v7  ;;  %v633_v10 = vpop.permute.xlu0 %632  ;;  %v637_v12 = vrot.slane %v635_v9, 4  ;;  %643 = vst.msk [vmem:[#allocation2 + $0x44] sm:$0x3] %vm350_vm0, %v635_v9  ;;  %1282 = vmatpush3.bf16.msra.mxu1 %v1369_v11 }
  0xae   : > { %592 = vst [vmem:[#allocation2 + $0x30] sm:$0x33] %v589_v8  ;;  %v636_v13 = vrot.slane %v633_v10, 4  ;;  %1283 = vmatprep.subr.bf16.mxu1 %v1427_v28 }
  0xb0   : > { %v638_v14 = vsel %vm375_vm4, %v636_v13, %v637_v12  ;;  %v664_v18 = vpop.permute.xlu1 %663  ;;  %v847_v12 = vld [vmem:[%s315_s9] sm:$0x3] }
  0xb1   : > { %v639_v17 = vsel %vm377_vm6, %v633_v10, %v638_v14  ;;  %v662_v19 = vpop.permute.xlu0 %661  ;;  %v854_v20 = vld [vmem:[#allocation2 + $0x24] sm:$0xff]  ;;  %v666_v22 = vrot.slane %v664_v18, 4  ;;  %672 = vst.msk [vmem:[#allocation2 + $0x44] sm:$0xc] %vm382_vm1, %v664_v18  ;;  %v1042_v18 = vld [vmem:[%s1707_s4] sm:$0x7] }
  0xb2   : > { %v1370_v21 = vld [vmem:[#allocation2 + $0x1c] ss:$12 sps:$4 sm:$0xff]   ;;  %642 = vst [vmem:[#allocation2 + $0x3c] sm:$0x33] %v639_v17  ;;  %v665_v23 = vrot.slane %v662_v19, 4  ;;  %v1255_v24 = vcombine.low %v852_v16, %v854_v20  ;;  %v1054_v17 = vsub.s32 2, %v1497_v4 }
  0xb3   : > { %960 = vmatprep.subr.bf16.mxu0 %v1370_v21 }
  0xb4   : > { %v667_v25 = vsel %vm375_vm4, %v665_v23, %v666_v22  ;;  %961 = vmatpush1.bf16.msra.mxu0 %v1255_v24  ;;  %v693_v27 = vpop.permute.xlu1 %692  ;;  %v1055_v22 = vrot.slane %v1042_v18, %v1054_v17  ;;  %v1046_v24 = vsub.s32 0, %v1497_v4 }
  0xb5   : > { %v668_v26 = vsel %vm408_vm5, %v662_v19, %v667_v25  ;;  %v691_v29 = vpop.permute.xlu0 %690  ;;  %v695_v30 = vrot.slane %v693_v27, 4  ;;  %701 = vst.msk [vmem:[#allocation2 + $0x50] sm:$0x3] %vm350_vm0, %v693_v27  ;;  %v856_v43 = vld [vmem:[#allocation2 + $0x30] sm:$0xff]  ;;  %v1050_v27 = vsub.s32 1, %v1497_v4 }
  0xb6   : > { %671 = vst [vmem:[#allocation2 + $0x3c] sm:$0xcc] %v668_v26  ;;  %v694_v31 = vrot.slane %v691_v29, 4 }
  0xb8   : > { %v696_v32 = vsel %vm375_vm4, %v694_v31, %v695_v30  ;;  %v722_v34 = vpop.permute.xlu1 %721  ;;  %v1372_v36 = vld [vmem:[#allocation2 + $0x38] ss:$12 sps:$4 sm:$0xff]  }
  0xb9   : > { %v697_v33 = vsel %vm438_vm8, %v691_v29, %v696_v32  ;;  %v720_v35 = vpop.permute.xlu0 %719  ;;  %v724_v37 = vrot.slane %v722_v34, 4  ;;  %730 = vst.msk [vmem:[#allocation2 + $0x50] sm:$0xc] %vm382_vm1, %v722_v34  ;;  %1284 = vmatpush3.bf16.msra.mxu1 %v1372_v36  ;;  %v1051_v36 = vrot.slane %v1042_v18, %v1050_v27 }
  0xba   : > { %700 = vst [vmem:[#allocation2 + $0x48] sm:$0x33] %v697_v33  ;;  %v723_v38 = vrot.slane %v720_v35, 4  ;;  %1285 = vmatprep.subr.bf16.mxu1 %v1427_v28  ;;  %v1047_v33 = vrot.slane %v1042_v18, %v1046_v24 }
  0xbc   : > { %v725_v39 = vsel %vm375_vm4, %v723_v38, %v724_v37  ;;  %v751_v41 = vpop.permute.xlu1 %750 }
  0xbd   : > { %v726_v40 = vsel %vm468_vm7, %v720_v35, %v725_v39  ;;  %v749_v42 = vpop.permute.xlu0 %748  ;;  %v858_v44 = vld [vmem:[#allocation2 + $0x3c] sm:$0xff]  ;;  %v753_v46 = vrot.slane %v751_v41, 4  ;;  %759 = vst.msk [vmem:[#allocation2 + $0x5c] sm:$0x3] %vm350_vm0, %v751_v41 }
  0xbe   : > { %v1373_v45 = vld [vmem:[#allocation2 + $0x34] ss:$12 sps:$4 sm:$0xff]   ;;  %729 = vst [vmem:[#allocation2 + $0x48] sm:$0xcc] %v726_v40  ;;  %v752_v47 = vrot.slane %v749_v42, 4  ;;  %v1258_v48 = vcombine.low %v856_v43, %v858_v44 }
  0xbf   : > { %962 = vmatprep.subr.bf16.mxu0 %v1373_v45 }
  0xc0   : > { %v754_v49 = vsel %vm375_vm4, %v752_v47, %v753_v46  ;;  %963 = vmatpush1.bf16.msra.mxu0 %v1258_v48  ;;  %v780_v51 = vpop.permute.xlu1 %779 }
  0xc1   : > { %v755_v50 = vsel %vm498_vm9, %v749_v42, %v754_v49  ;;  %v778_v52 = vpop.permute.xlu0 %777  ;;  %v782_v53 = vrot.slane %v780_v51, 4  ;;  %788 = vst.msk [vmem:[#allocation2 + $0x5c] sm:$0xc] %vm382_vm1, %v780_v51  ;;  %vm1095_vm1 = vcmask 414724  }
  0xc2   : > { %758 = vst [vmem:[#allocation2 + $0x54] sm:$0x33] %v755_v50  ;;  %v781_v54 = vrot.slane %v778_v52, 4 }
  0xc4   : > { %v783_v55 = vsel %vm375_vm4, %v781_v54, %v782_v53  ;;  %v809_v57 = vpop.permute.xlu1 %808 }
  0xc5   : > { %v784_v56 = vsel %vm528_vm10, %v778_v52, %v783_v55  ;;  %v807_v58 = vpop.permute.xlu0 %806  ;;  %v811_v59 = vrot.slane %v809_v57, 4  ;;  %817 = vst.msk [vmem:[#allocation2 + $0x68] sm:$0x3] %vm350_vm0, %v809_v57  ;;  %vm1094_vm0 = vmor %vm1093_vm15, %vm1092_vm14 }
  0xc6   : > { %787 = vst [vmem:[#allocation2 + $0x54] sm:$0xcc] %v784_v56  ;;  %v810_v60 = vrot.slane %v807_v58, 4  ;;  %vm1096_vm3 = vmor %vm1095_vm1, %vm1094_vm0 }
  0xc8   : > { %v812_v61 = vsel %vm375_vm4, %v810_v60, %v811_v59  ;;  %v838_v63 = vpop.permute.xlu1 %837  ;;  %v1375_v1 = vld [vmem:[#allocation2 + $0x50] ss:$12 sps:$4 sm:$0xff]  }
  0xc9   : > { %v813_v62 = vsel %vm558_vm11, %v807_v58, %v812_v61  ;;  %v836_v0 = vpop.permute.xlu0 %835  ;;  %v840_v2 = vrot.slane %v838_v63, 4  ;;  %1286 = vmatpush3.bf16.msra.mxu1 %v1375_v1 }
  0xca   : > { %816 = vst [vmem:[#allocation2 + $0x60] sm:$0x33] %v813_v62  ;;  %v839_v3 = vrot.slane %v836_v0, 4  ;;  %1287 = vmatprep.subr.bf16.mxu1 %v1427_v28 }
  0xcc   : > { %v841_v6 = vsel %vm375_vm4, %v839_v3, %v840_v2  ;;  %v1379_v10 = vld [vmem:[#allocation2 + $0x68] ss:$0 sps:$4 sm:$0xff]  }
  0xcd   : > { %v842_v7 = vsel %vm588_vm12, %v836_v0, %v841_v6  ;;  %v1376_v8 = vld [vmem:[#allocation2 + $0x4c] ss:$12 sps:$4 sm:$0xff]   ;;  %v1378_v9 = vld [vmem:[#allocation2 + $0x48] ss:$12 sps:$4 sm:$0xff]   ;;  %v956_v11 = vsel %vm375_vm4, %v1379_v10, 0 }
  0xce   : > { %845 = vst [vmem:[#allocation2 + $0x60] sm:$0xcc] %v842_v7  ;;  %964 = vmatprep.subr.bf16.mxu0 %v1376_v8  ;;  %1288 = vmatpush3.bf16.msra.mxu1 %v956_v11 }
  0xcf   : > { %965 = vmatpush1.bf16.msra.mxu0 %v1378_v9 }
  0xd1   : > { %1290 = vmatmul.mubr.msk.bf16.vlgmr.msra.gmra.mrb[0].mxu1 %vm944_vm13, %v847_v12 }
  0xd5   : > { %v864_v13 = vld [vmem:[#allocation2 + $0x60] sm:$0xff] }
  0xd6   : > { %v1265_v28 = vcombine.high %v864_v13, %v864_v13  ;;  %v1264_v14 = vcombine.low %v864_v13, %v864_v13 }
  0xd8   : > { %1267 = vmatprep.subr.msk.bf16.mxu0 %vm375_vm4, %v1265_v28  ;;  %v950_v16 = vsel %vm375_vm4, %v1264_v14, 0  ;;  %vm1098_vm4 = vcmask 697752  }
  0xd9   : > { %967 = vmatpush1.bf16.msra.mxu0 %v950_v16 }
  0xda   : > { %v870_v19 = vpop.permute.xlu0 %869 }
  0xdc   : > { %1268 = vmatmul.mubr.msk.bf16.vlgmr.msra.gmra.mrb[0].mxu0 %vm944_vm13, %v847_v12 }
 0x1a4   : > { %v1033_v20 = vpop.f32.mrb[0].mxu1 }
 0x1a5   : > { %v1291_v21 = vpop.f32.mrb[1].mxu1  ;;  %v1034_v23 = vadd.f32 %v1033_v20, %v870_v19 }
 0x1a6   : > { %v1036_v25 = vpop.f32.mrb[2].mxu1 }
 0x1a7   : > { %v1041_v26 = vmax.f32 %v1034_v23, 0.0  ;;  %v1292_v29 = vpop.f32.mrb[3].mxu1 }
 0x1a9   : > { %v1061_v30 = vmul.f32 %v1055_v22, %v1041_v26 }
 0x1ab   : > { %v1066_v40 = vpack.c.bf16 %v1061_v30, %v1061_v30 }
 0x1ad   : > { %v1084_v45 = vrot.slane %v1066_v40, %v1501_v5 }
 0x1af   : > { %v992_v31 = vpop.f32.mrb[0].mxu0 }
 0x1b0   : > { %v993_v32 = vadd.f32 %v992_v31, %v870_v19  ;;  %v994_v34 = vpop.f32.mrb[1].mxu0 }
 0x1b1   : > { %v995_v35 = vadd.f32 %v994_v34, %v870_v19  ;;  %v996_v37 = vpop.f32.mrb[2].mxu0 }
 0x1b2   : > { %v1039_v38 = vmax.f32 %v993_v32, 0.0  ;;  %v997_v39 = vpop.f32.mrb[3].mxu0 }
 0x1b3   : > { %v1040_v41 = vmax.f32 %v995_v35, 0.0 }
 0x1b4   : > { %v1059_v42 = vmul.f32 %v1047_v33, %v1039_v38 }
 0x1b5   : > { %v1060_v43 = vmul.f32 %v1051_v36, %v1040_v41 }
 0x1b7   : > { %v1270_v44 = vpack.c.bf16 %v1060_v43, %v1059_v42 }
 0x1b9   : > { %v1077_v4 = vrot.slane %v1270_v44, %v1501_v5 }
 0x1bb   : > { %v1085_v46 = vcombine.low %v1077_v4, %v1084_v45 }
 0x1bd   : > { %1086 = vrot.lane.b32.xlu1 %v1085_v46, %s1434_s11 }
 0x22f   : > { %v1087_v47 = vpop.permute.xlu1 %1086 }
 0x230   : > { %v1088_v48 = vrot.slane %v1087_v47, 6 }
 0x232   : > { %v1090_v49 = vsel %vm1089_vm2, %v1088_v48, %v1087_v47 }
 0x233   : > { %1097 = vst.msk [vmem:[%s1609_s26] sm:$0x3f] %vm1096_vm3, %v1090_v49 }
 0x234   : > { %1099 = vst.msk [vmem:[%s1609_s26 + $0x4] sm:$0x3] %vm1098_vm4, %v1433_v15 }
 0x235 PF: > { %s15_s22 = sadd.s32 1, %s1420_s22   ;;  %s1709_s18 = smov %s1412_s20 }
 0x236   : > { %p12_p7 = scmp.ge.s32.totalorder %s15_s22, 6   ;;  %s1710_s19 = smov %s1416_s21 }
 0x237   : > { %s1711_s20 = smov %s1714_s23  ;;  %s1712_s21 = smov %s1718_s24 }
 0x238   :  { %14 = sbr.rel (!%p12_p7) target bundleno = 3 (0x3), region = 79 }

// kernel: dual_stream_up_forward.5
= control target key start
LH: loop header
LB: loop body
LE: loop exit
PB: predicated region body
PF: predicated region fallthrough
CT: control target
= control target key end

     0   :  { %s1042_s15 = smov 0   ;;  %s1044_s16 = smov 0   ;;  %s1176_s0 = inlined_call_operand.vmem [shape: bf16[2,2,4,342], index: 0, kind: input, shape index: {}]   ;;  %s1177_s1 = inlined_call_operand.vmem [shape: bf16[2,4,36], index: 1, kind: input, shape index: {}]   ;;  %s1178_s2 = inlined_call_operand.vmem [shape: f32[2,4,1], index: 2, kind: input, shape index: {}]   ;;  %s1179_s3 = inlined_call_operand.vmem [shape: f32[1,288], index: 3, kind: input, shape index: {}]   ;;  %s1180_s4 = inlined_call_operand.vmem [shape: f32[2,2,4,342], index: 4, kind: output, shape index: {}]  }
   0x1   :  { %s1046_s17 = smov 0   ;;  %s1048_s18 = smov 0  }
   0x2   :  { %s1050_s19 = smov 0  }
   0x3 LB: > { %s23_s20 = sadd.s32 1, %s994_s17  ;;  %s26_s21 = sadd.s32 1, %s998_s18  ;;  %s1002_s19 = sphi %s1050_s19, %s14_s19   ;;  %s998_s18 = sphi %s1048_s18, %s1184_s18   ;;  %s994_s17 = sphi %s1046_s17, %s1183_s17   ;;  %s990_s16 = sphi %s1044_s16, %s1182_s16   ;;  %s986_s15 = sphi %s1042_s15, %s1181_s15  }
   0x4   : > { %p24_p0 = scmp.ge.s32.totalorder %s23_s20, 2  ;;  %p855_p1 = scmp.ge.s32.totalorder %s1002_s19, 1 }
   0x5   : > { %p200_p2 = scmp.lt.s32.totalorder %s1002_s19, 5 }
   0x6   : > { %s1186_s20 = smov (%p24_p0, %s23_s20), 0  ;;  %s1188_s21 = smov (!%p24_p0, %s26_s21), %s998_s18 }
   0x7   : > { %p201_p3 = pnand %p855_p1, %p200_p2  ;;  %p28_p4 = scmp.ge.s32.totalorder %s1188_s21, 2 }
   0x8   : > { %p242_p5 = scmp.lt.s32.totalorder (!%p201_p3), %s990_s16, 1  ;;  %p244_p6 = scmp.lt.s32.totalorder (!%p201_p3), %s986_s15, 1  ;;  %v282_v0 = vlaneseq (!%p201_p3)  ;;  %v1004_v1 = vmov (!%p201_p3), 1983009808   ;;  %vm289_vm0 = vcmask (!%p201_p3), 254976   ;;  %v1009_v24 = vmov (!%p201_p3), 0.0  }
   0x9   : > { %s1190_s21 = smov (%p28_p4, %s1188_s21), 0  ;;  %204 = sbr.rel (%p201_p3) target bundleno = 531 (0x213), region = 36 }
   0xa   : > { %v280_v2 = vunpack.c.l.s4 (!%p201_p3), %v1004_v1  ;;  %v1074_v4 = vshrl.u32 (!%p201_p3), %v282_v0, 7  ;;  %s1005_s29 = smov (!%p201_p3), 126   ;;  %s1006_s30 = smov (!%p201_p3), 127   ;;  %879 = vmatprep.subr.bf16.mxu1 (!%p201_p3), %v1009_v24  ;;  %v1014_v42 = vmov (!%p201_p3), 0   ;;  %vm1015_vm1 = vmmov (!%p201_p3), 0  }
   0xb   : > { %s1007_s5 = smov (!%p201_p3), 110   ;;  %s1008_s6 = smov (!%p201_p3), 109   ;;  %636 = vmatprep.mubr.bf16.mxu0 (!%p201_p3), %v1014_v42  ;;  %944 = vset.pattern.permute.xlu0 (!%p201_p3), %v1014_v42  ;;  %vm321_vm2 = vcmask (!%p201_p3), 257026   ;;  %vm314_vm3 = vcmask (!%p201_p3), 1043456   ;;  %vm347_vm4 = vcmask (!%p201_p3), 1031168   ;;  %vm316_vm5 = vcmask (!%p201_p3), 1039360  }
   0xc   : > { %v281_v3 = vunpack.c.0.s8 (!%p201_p3), %v280_v2  ;;  %s1010_s7 = smov (!%p201_p3), 108   ;;  %s1011_s8 = smov (!%p201_p3), 92   ;;  %885 = vmatprep.mubr.msk.bf16.mxu1 (!%p201_p3), %vm1015_vm1, %v1009_v24  ;;  %vm407_vm6 = vcmask (!%p201_p3), 891904   ;;  %vm377_vm7 = vcmask (!%p201_p3), 900096   ;;  %vm437_vm8 = vcmask (!%p201_p3), 883712  }
   0xd   : > { %s1012_s9 = smov (!%p201_p3), 91   ;;  %s1013_s10 = smov (!%p201_p3), 90   ;;  %vm467_vm9 = vcmask (!%p201_p3), 752640   ;;  %vm497_vm10 = vcmask (!%p201_p3), 744448   ;;  %vm527_vm11 = vcmask (!%p201_p3), 736256   ;;  %vm594_vm12 = vcmask (!%p201_p3), 1041408  }
   0xe   : > { %v1080_v5 = vsub.s32 (!%p201_p3), %v281_v3, %v1074_v4  ;;  %vm590_vm13 = vcmask (!%p201_p3), 293888   ;;  %vm708_vm14 = vcmask (!%p201_p3), 150528   ;;  %vm724_vm15 = vcmask (!%p201_p3), 1043608  }
   0xf   : > { %vm719_vm1 = vcmask (!%p201_p3), 154624  }
  0x10   : > { %s1192_s16 = smov (!%p242_p5, %s990_s16), 1  ;;  %s1194_s15 = smov (!%p244_p6, %s986_s15), 1 }
  0x11   : > { %s890_s22 = smul.u32 6, %s1192_s16  ;;  %s858_s11 = sshll.u32 %s1192_s16, 2 }
  0x12   : > { %s889_s23 = smul.u32 3, %s1194_s15  ;;  %s258_s14 = scalar_lea.vmem %s1178_s2, %s858_s11 }
  0x13   : > { %v544_v43 = vld [vmem:[%s258_s14] sm:$0xf]  ;;  %s857_s15 = sshll.u32 %s1192_s16, 1 }
  0x14   : > { %s1077_s24 = sadd.s32 %s890_s22, %s889_s23 }
  0x15   : > { %s856_s25 = sshll.u32 %s1077_s24, 1  ;;  %s859_s16 = sshll.u32 %s1077_s24, 2 }
  0x16   : > { %s1086_s28 = scalar_lea.vmem %s1176_s0, %s856_s25  ;;  %s254_s25 = scalar_lea.vmem %s1177_s1, %s857_s15 }
  0x17   : > { %v323_v6 = vld [vmem:[%s1086_s28] sm:$0x3f]  ;;  %s1016_s24 = smov 19  }
  0x18   : > { %v291_v7 = vld [vmem:[%s1086_s28] sm:$0x3f]  ;;  %v332_v9 = vrot.slane %v323_v6, %v1080_v5  ;;  %v325_v12 = vcombine.high %v323_v6, %v323_v6 }
  0x19   : > { %v353_v8 = vld [vmem:[%s1086_s28] sm:$0x3f]  ;;  %v307_v10 = vrot.slane %v291_v7, %v1080_v5  ;;  %v293_v14 = vcombine.low %v291_v7, %v291_v7 }
  0x1a   : > { %v383_v11 = vld [vmem:[%s1086_s28] sm:$0x3f]  ;;  %340 = vrot.lane.b32.xlu1 %v332_v9, %s1005_s29  ;;  %v369_v15 = vrot.slane %v353_v8, %v1080_v5  ;;  %v339_v19 = vrot.slane %v325_v12, %v1080_v5  ;;  %v355_v21 = vcombine.low %v353_v8, %v353_v8 }
  0x1b   : > { %v269_v13 = vld [vmem:[%s1086_s28] sm:$0x3f]  ;;  %310 = vrot.lane.b32.xlu0 %v307_v10, %s1006_s30  ;;  %v392_v16 = vrot.slane %v383_v11, %v1080_v5  ;;  %v385_v17 = vcombine.high %v383_v11, %v383_v11  ;;  %v300_v20 = vrot.slane %v293_v14, %v1080_v5 }
  0x1c   : > { %860 = vst.sshfl [vmem:[#allocation2] sm:$0xf pattern:$0x76325410] %v269_v13  ;;  %v271_v18 = vcombine.high %v269_v13, %v269_v13  ;;  %v413_v22 = vld [vmem:[%s1086_s28] sm:$0x3f]  ;;  %v362_v26 = vrot.slane %v355_v21, %v1080_v5 }
  0x1d   : > { %v399_v25 = vrot.slane %v385_v17, %v1080_v5  ;;  %v415_v27 = vcombine.low %v413_v22, %v413_v22  ;;  %v443_v28 = vld [vmem:[%s1086_s28] sm:$0x3f]  ;;  %v429_v29 = vrot.slane %v413_v22, %v1080_v5 }
  0x1e   : > { %372 = vrot.lane.b32.xlu1 %v369_v15, %s1007_s5  ;;  %v285_v23 = vrot.slane %v271_v18, %v1080_v5  ;;  %v445_v31 = vcombine.high %v443_v28, %v443_v28  ;;  %v473_v32 = vld [vmem:[%s1086_s28] sm:$0x3f]  ;;  %v452_v34 = vrot.slane %v443_v28, %v1080_v5 }
  0x1f   : > { %400 = vrot.lane.b32.xlu0 %v392_v16, %s1008_s6  ;;  %v422_v30 = vrot.slane %v415_v27, %v1080_v5  ;;  %v475_v35 = vcombine.low %v473_v32, %v473_v32  ;;  %v503_v36 = vld [vmem:[%s1086_s28] sm:$0x3f]  ;;  %v489_v37 = vrot.slane %v473_v32, %v1080_v5  ;;  %s1147_s28 = scalar_lea.vmem %s1180_s4, %s859_s16 }
  0x20   : > { %290 = vst.msk [vmem:[#allocation2 + $0x8] sm:$0x3] %vm289_vm0, %v285_v23  ;;  %v459_v33 = vrot.slane %v445_v31, %v1080_v5  ;;  %v505_v39 = vcombine.high %v503_v36, %v503_v36  ;;  %v512_v41 = vrot.slane %v503_v36, %v1080_v5 }
  0x21   : > { %v482_v38 = vrot.slane %v475_v35, %v1080_v5  ;;  %709 = vst.msk [vmem:[%s1147_s28] sm:$0xf] %vm708_vm14, %v1009_v24 }
  0x22   : > { %342 = vrot.lane.b32.xlu1 %v339_v19, %s1005_s29  ;;  %v519_v40 = vrot.slane %v505_v39, %v1080_v5 }
  0x23   : > { %308 = vrot.lane.b32.xlu0 %v300_v20, %s1006_s30 }
  0x26   : > { %402 = vrot.lane.b32.xlu1 %v399_v25, %s1008_s6 }
  0x27   : > { %370 = vrot.lane.b32.xlu0 %v362_v26, %s1007_s5 }
  0x2a   : > { %432 = vrot.lane.b32.xlu1 %v429_v29, %s1010_s7 }
  0x2b   : > { %430 = vrot.lane.b32.xlu0 %v422_v30, %s1010_s7 }
  0x2e   : > { %462 = vrot.lane.b32.xlu1 %v459_v33, %s1011_s8 }
  0x2f   : > { %460 = vrot.lane.b32.xlu0 %v452_v34, %s1011_s8 }
  0x32   : > { %492 = vrot.lane.b32.xlu1 %v489_v37, %s1012_s9 }
  0x33   : > { %490 = vrot.lane.b32.xlu0 %v482_v38, %s1012_s9 }
  0x36   : > { %522 = vrot.lane.b32.xlu1 %v519_v40, %s1013_s10 }
  0x37   : > { %520 = vrot.lane.b32.xlu0 %v512_v41, %s1013_s10  ;;  %v533_v41 = vld [vmem:[%s254_s25] sm:$0x3] }
  0x3b   : > { %547 = vperm.xlu0 %944, %v544_v43  }
  0x8c   : > { %v341_v44 = vpop.permute.xlu1 %340 }
  0x8d   : > { %v311_v45 = vpop.permute.xlu0 %310  ;;  %v344_v50 = vrot.slane %v341_v44, 4 }
  0x8e   : > { %322 = vst.msk [vmem:[#allocation2 + $0x8] sm:$0xc] %vm321_vm2, %v311_v45  ;;  %v313_v51 = vrot.slane %v311_v45, 4 }
  0x90   : > { %v373_v46 = vpop.permute.xlu1 %372 }
  0x91   : > { %v401_v47 = vpop.permute.xlu0 %400  ;;  %382 = vst.msk [vmem:[#allocation2 + $0x14] sm:$0xc] %vm321_vm2, %v373_v46  ;;  %v375_v60 = vrot.slane %v373_v46, 4  ;;  %v692_v46 = vsub.s32 0, %v1074_v4 }
  0x92   : > { %v404_v61 = vrot.slane %v401_v47, 4 }
  0x94   : > { %v343_v48 = vpop.permute.xlu1 %342 }
  0x95   : > { %v309_v49 = vpop.permute.xlu0 %308  ;;  %v345_v52 = vrot.slane %v343_v48, 4  ;;  %352 = vst.msk [vmem:[#allocation2 + $0x14] sm:$0x3] %vm289_vm0, %v343_v48 }
  0x96   : > { %v312_v53 = vrot.slane %v309_v49, 4 }
  0x97   : > { %v346_v54 = vsel %vm314_vm3, %v344_v50, %v345_v52  ;;  %v696_v50 = vsub.s32 1, %v1074_v4 }
  0x98   : > { %v315_v55 = vsel %vm314_vm3, %v312_v53, %v313_v51  ;;  %v348_v56 = vsel %vm347_vm4, %v341_v44, %v346_v54  ;;  %v403_v58 = vpop.permute.xlu1 %402  ;;  %vm730_vm4 = vcmask 699800  }
  0x99   : > { %v317_v57 = vsel %vm316_vm5, %v309_v49, %v315_v55  ;;  %v371_v59 = vpop.permute.xlu0 %370  ;;  %351 = vst [vmem:[#allocation2 + $0xc] sm:$0x33] %v348_v56  ;;  %v405_v62 = vrot.slane %v403_v58, 4  ;;  %412 = vst.msk [vmem:[#allocation2 + $0x20] sm:$0x3] %vm289_vm0, %v403_v58 }
  0x9a   : > { %320 = vst [vmem:[#allocation2] sm:$0xcc] %v317_v57  ;;  %v374_v63 = vrot.slane %v371_v59, 4  ;;  %v688_v49 = vld [vmem:[%s1179_s3] sm:$0x7] }
  0x9b   : > { %v406_v0 = vsel %vm314_vm3, %v404_v61, %v405_v62  ;;  %v693_v55 = vrot.slane %v688_v49, %v692_v46  ;;  %v697_v58 = vrot.slane %v688_v49, %v696_v50 }
  0x9c   : > { %v376_v1 = vsel %vm314_vm3, %v374_v63, %v375_v60  ;;  %v408_v2 = vsel %vm407_vm6, %v401_v47, %v406_v0  ;;  %v433_v5 = vpop.permute.xlu1 %432  ;;  %v954_v7 = vld [vmem:[#allocation2 + $0x8] ss:$12 sps:$4 sm:$0xff]   ;;  %v700_v0 = vsub.s32 2, %v1074_v4 }
  0x9d   : > { %v378_v3 = vsel %vm377_vm7, %v371_v59, %v376_v1  ;;  %v431_v6 = vpop.permute.xlu0 %430  ;;  %411 = vst [vmem:[#allocation2 + $0x18] sm:$0x33] %v408_v2  ;;  %v435_v8 = vrot.slane %v433_v5, 4  ;;  %442 = vst.msk [vmem:[#allocation2 + $0x20] sm:$0xc] %vm321_vm2, %v433_v5  ;;  %880 = vmatpush3.bf16.msra.mxu1 %v954_v7 }
  0x9e   : > { %381 = vst [vmem:[#allocation2 + $0xc] sm:$0xcc] %v378_v3  ;;  %v434_v9 = vrot.slane %v431_v6, 4  ;;  %881 = vmatprep.subr.bf16.mxu1 %v1009_v24  ;;  %v701_v5 = vrot.slane %v688_v49, %v700_v0 }
  0xa0   : > { %v436_v10 = vsel %vm314_vm3, %v434_v9, %v435_v8  ;;  %v463_v12 = vpop.permute.xlu1 %462 }
  0xa1   : > { %v438_v11 = vsel %vm437_vm8, %v431_v6, %v436_v10  ;;  %v461_v13 = vpop.permute.xlu0 %460  ;;  %v465_v14 = vrot.slane %v463_v12, 4  ;;  %472 = vst.msk [vmem:[#allocation2 + $0x2c] sm:$0x3] %vm289_vm0, %v463_v12  ;;  %v534_v17 = vld [vmem:[#allocation2] sm:$0xff] }
  0xa2   : > { %441 = vst [vmem:[#allocation2 + $0x18] sm:$0xcc] %v438_v11  ;;  %v464_v15 = vrot.slane %v461_v13, 4 }
  0xa4   : > { %v466_v16 = vsel %vm314_vm3, %v464_v15, %v465_v14  ;;  %v493_v19 = vpop.permute.xlu1 %492 }
  0xa5   : > { %v468_v18 = vsel %vm467_vm9, %v461_v13, %v466_v16  ;;  %v491_v20 = vpop.permute.xlu0 %490  ;;  %v536_v21 = vld [vmem:[#allocation2 + $0xc] sm:$0xff]  ;;  %v495_v23 = vrot.slane %v493_v19, 4  ;;  %502 = vst.msk [vmem:[#allocation2 + $0x2c] sm:$0xc] %vm321_vm2, %v493_v19 }
  0xa6   : > { %v955_v22 = vld [vmem:[#allocation2 + $0x4] ss:$12 sps:$4 sm:$0xff]   ;;  %471 = vst [vmem:[#allocation2 + $0x24] sm:$0x33] %v468_v18  ;;  %v494_v25 = vrot.slane %v491_v20, 4  ;;  %v861_v26 = vcombine.low %v534_v17, %v536_v21 }
  0xa7   : > { %604 = vmatprep.subr.bf16.mxu0 %v955_v22 }
  0xa8   : > { %v496_v27 = vsel %vm314_vm3, %v494_v25, %v495_v23  ;;  %605 = vmatpush1.bf16.msra.mxu0 %v861_v26  ;;  %v523_v29 = vpop.permute.xlu1 %522 }
  0xa9   : > { %v498_v28 = vsel %vm497_vm10, %v491_v20, %v496_v27  ;;  %v521_v30 = vpop.permute.xlu0 %520  ;;  %v525_v31 = vrot.slane %v523_v29, 4  ;;  %532 = vst.msk [vmem:[#allocation2 + $0x38] sm:$0x3] %vm289_vm0, %v523_v29  ;;  %vm725_vm0 = vcmask 1047556  }
  0xaa   : > { %501 = vst [vmem:[#allocation2 + $0x24] sm:$0xcc] %v498_v28  ;;  %v524_v32 = vrot.slane %v521_v30, 4  ;;  %vm726_vm2 = vmor %vm725_vm0, %vm724_vm15 }
  0xac   : > { %v526_v33 = vsel %vm314_vm3, %v524_v32, %v525_v31  ;;  %v957_v35 = vld [vmem:[#allocation2 + $0x20] ss:$12 sps:$4 sm:$0xff]   ;;  %vm728_vm3 = vcmask 412672  }
  0xad   : > { %v528_v34 = vsel %vm527_vm11, %v521_v30, %v526_v33  ;;  %882 = vmatpush3.bf16.msra.mxu1 %v957_v35 }
  0xae   : > { %531 = vst [vmem:[#allocation2 + $0x30] sm:$0x33] %v528_v34  ;;  %883 = vmatprep.subr.bf16.mxu1 %v1009_v24 }
  0xb0   : > { %v961_v38 = vld [vmem:[#allocation2 + $0x38] ss:$0 sps:$4 sm:$0x33]  }
  0xb1   : > { %v958_v36 = vld [vmem:[#allocation2 + $0x1c] ss:$12 sps:$4 sm:$0xff]   ;;  %v960_v37 = vld [vmem:[#allocation2 + $0x18] ss:$12 sps:$4 sm:$0xff]   ;;  %v602_v39 = vsel %vm594_vm12, %v961_v38, 0 }
  0xb2   : > { %606 = vmatprep.subr.bf16.mxu0 %v958_v36  ;;  %884 = vmatpush3.bf16.msra.mxu1 %v602_v39 }
  0xb3   : > { %607 = vmatpush1.bf16.msra.mxu0 %v960_v37 }
  0xb5   : > { %v542_v40 = vld [vmem:[#allocation2 + $0x30] sm:$0x33]  ;;  %886 = vmatmul.mubr.msk.bf16.vlgmr.msra.gmra.mrb[0].mxu1 %vm590_vm13, %v533_v41 }
  0xb6   : > { %v868_v42 = vcombine.high %v542_v40, %v542_v40  ;;  %v867_v43 = vcombine.low %v542_v40, %v542_v40 }
  0xb8   : > { %870 = vmatprep.subr.msk.bf16.mxu0 %vm594_vm12, %v868_v42  ;;  %v596_v44 = vsel %vm594_vm12, %v867_v43, 0 }
  0xb9   : > { %609 = vmatpush1.bf16.msra.mxu0 %v596_v44 }
  0xba   : > { %v548_v48 = vpop.permute.xlu0 %547 }
  0xbc   : > { %871 = vmatmul.mubr.msk.bf16.vlgmr.msra.gmra.mrb[0].mxu0 %vm590_vm13, %v533_v41 }
 0x188   : > { %v679_v45 = vpop.f32.mrb[0].mxu1 }
 0x189   : > { %v887_v47 = vpop.f32.mrb[1].mxu1  ;;  %v680_v63 = vadd.f32 %v679_v45, %v548_v48 }
 0x18a   : > { %v682_v51 = vpop.f32.mrb[2].mxu1 }
 0x18b   : > { %v888_v52 = vpop.f32.mrb[3].mxu1  ;;  %v687_v3 = vmax.f32 %v680_v63, 0.0 }
 0x18d   : > { %v707_v7 = vmul.f32 %v701_v5, %v687_v3 }
 0x18f   : > { %v638_v53 = vpop.f32.mrb[0].mxu0 }
 0x190   : > { %v639_v54 = vadd.f32 %v638_v53, %v548_v48  ;;  %v640_v56 = vpop.f32.mrb[1].mxu0 }
 0x191   : > { %v641_v57 = vadd.f32 %v640_v56, %v548_v48  ;;  %v642_v59 = vpop.f32.mrb[2].mxu0 }
 0x192   : > { %v685_v60 = vmax.f32 %v639_v54, 0.0  ;;  %v643_v61 = vpop.f32.mrb[3].mxu0 }
 0x193   : > { %v686_v62 = vmax.f32 %v641_v57, 0.0 }
 0x194   : > { %v705_v1 = vmul.f32 %v693_v55, %v685_v60 }
 0x195   : > { %v706_v2 = vmul.f32 %v697_v58, %v686_v62 }
 0x197   : > { %v713_v6 = vcombine.low %v705_v1, %v706_v2 }
 0x199   : > { %714 = vrot.lane.b32.xlu1 %v713_v6, %s1016_s24 }
 0x19d   : > { %716 = vrot.lane.b32.xlu1 %v707_v7, %s1016_s24 }
 0x20b   : > { %v715_v8 = vpop.permute.xlu1 %714 }
 0x20c   : > { %v718_v9 = vrot.slane %v715_v8, 4 }
 0x20e   : > { %v720_v10 = vsel %vm719_vm1, %v718_v9, %v715_v8 }
 0x20f   : > { %727 = vst.msk [vmem:[%s1147_s28] sm:$0xff] %vm726_vm2, %v720_v10  ;;  %v717_v4 = vpop.permute.xlu1 %716 }
 0x210   : > { %v721_v11 = vsel %vm719_vm1, %v718_v9, %v717_v4 }
 0x211   : > { %729 = vst.msk [vmem:[%s1147_s28 + $0x8] sm:$0xf] %vm728_vm3, %v721_v11 }
 0x212   : > { %731 = vst.msk [vmem:[%s1147_s28 + $0x8] sm:$0xf] %vm730_vm4, %v1009_v24 }
 0x213 PF: > { %s14_s19 = sadd.s32 1, %s1002_s19   ;;  %s1181_s15 = smov %s994_s17 }
 0x214   : > { %p11_p7 = scmp.ge.s32.totalorder %s14_s19, 6   ;;  %s1182_s16 = smov %s998_s18 }
 0x215   : > { %s1183_s17 = smov %s1186_s20  ;;  %s1184_s18 = smov %s1190_s21 }
 0x216   :  { %13 = sbr.rel (!%p11_p7) target bundleno = 3 (0x3), region = 72 }

</bundles_post_ra>
